<compile_context>
chip_gen: v5e
topology: v5e:2x2
jax: 0.10.0
libtpu: 0.0.40
codegen_flags: <defaults>
</compile_context>

<pallas_src>
import jax
import jax.numpy as jnp
from jax.experimental import pallas as pl
from jax.experimental.pallas import tpu as pltpu

# small, module-consistent shapes
B, S, D, H, E, L = 2, 8, 32, 4, 16, 2      # batch, seq, width, heads, proj dim, layers
HD = D // H
EPS = 1e-5
NEG = -1e30


# ----------------------------------------------------------------------------
# Kernel
# ----------------------------------------------------------------------------
def _layernorm(x, w, b):
    mu = jnp.mean(x, axis=-1, keepdims=True)
    var = jnp.mean(jnp.square(x - mu), axis=-1, keepdims=True)
    return (x - mu) * jax.lax.rsqrt(var + EPS) * w + b


def fused_kernel(eot_ref,                       # scalar prefetch: (B,) int32 EOT indices
                 x0_ref, pos_ref,               # (B*S, D), (S, D)
                 ln1w, ln1b, wq, bq, wk, bk, wv, bv, wo, bo,
                 ln2w, ln2b, w1, b1, w2, b2,    # per-layer (L squeezed by BlockSpec)
                 lnfw, lnfb, proj,              # final LN + projection
                 o_ref,                         # (B, E) output
                 x_sc):                         # (B*S, D) VMEM-resident activations
    l = pl.program_id(0)

    # ---- layer 0: fuse the positional-embedding add (broadcast over batch) --
    @pl.when(l == 0)
    def _():
        x_sc[...] = (x0_ref[...].reshape(B, S, D)
                     + pos_ref[...][None, :, :]).reshape(B * S, D)

    x = x_sc[...]                               # (B*S, D)

    # ---- LN1 + causal multi-head self-attention ----------------------------
    xn = _layernorm(x, ln1w[...], ln1b[...])

    qi = jax.lax.broadcasted_iota(jnp.int32, (S, S), 0)
    ki = jax.lax.broadcasted_iota(jnp.int32, (S, S), 1)
    allowed = (ki <= qi)[None]                  # (1, S, S) causal mask (triu_(1) = -inf)
    scale = 1.0 / (HD ** 0.5)

    attn = jnp.zeros((B * S, D), jnp.float32)
    for h in range(H):                          # static unroll; per-head weights -> no lane slicing
        qh = (jnp.dot(xn, wq[h], preferred_element_type=jnp.float32) + bq[h]) * scale
        kh = jnp.dot(xn, wk[h], preferred_element_type=jnp.float32) + bk[h]
        vh = jnp.dot(xn, wv[h], preferred_element_type=jnp.float32) + bv[h]
        q3 = qh.reshape(B, S, HD)
        k3 = kh.reshape(B, S, HD)
        v3 = vh.reshape(B, S, HD)
        s = jnp.einsum("bqe,bke->bqk", q3, k3,
                       preferred_element_type=jnp.float32)          # (B, S, S)
        s = jnp.where(allowed, s, NEG)
        s = s - jnp.max(s, axis=-1, keepdims=True)
        p = jnp.exp(s)
        p = p * pl.reciprocal(jnp.sum(p, axis=-1, keepdims=True), approx=True)
        head = jnp.einsum("bqk,bke->bqe", p, v3,
                          preferred_element_type=jnp.float32)        # (B, S, HD)
        # fold head output straight through its slice of the output projection
        # (equivalent to concat(heads) @ W_o, without the concatenate)
        attn = attn + jnp.dot(head.reshape(B * S, HD), wo[h],
                              preferred_element_type=jnp.float32)
    x = x + attn + bo[...]

    # ---- LN2 + MLP (QuickGELU) ----------------------------------------------
    xn2 = _layernorm(x, ln2w[...], ln2b[...])
    hdn = jnp.dot(xn2, w1[...], preferred_element_type=jnp.float32) + b1[...]
    hdn = hdn * jax.nn.sigmoid(1.702 * hdn)
    x = x + jnp.dot(hdn, w2[...], preferred_element_type=jnp.float32) + b2[...]

    x_sc[...] = x                               # activations stay resident in VMEM

    # ---- last layer: final LN + EOT gather + text_projection ---------------
    @pl.when(l == L - 1)
    def _():
        sidx = jax.lax.broadcasted_iota(jnp.int32, (S, 1), 0)
        rows = []
        for b in range(B):                      # gather EOT row per batch element
            sel = (sidx == eot_ref[b]).astype(jnp.float32)           # (S, 1)
            rows.append(jnp.sum(x[b * S:(b + 1) * S, :] * sel,
                                axis=0, keepdims=True))              # (1, D)
        g = jnp.concatenate(rows, axis=0)                            # (B, D)
        g = _layernorm(g, lnfw[...], lnfb[...])                      # LN only gathered rows
        o_ref[...] = jnp.dot(g, proj[...], preferred_element_type=jnp.float32)


# ----------------------------------------------------------------------------
# pallas_call wrapper (single fused call)
# ----------------------------------------------------------------------------
def text_encoder(prompts, tokenized_prompts, params):
    eot = jnp.argmax(tokenized_prompts, axis=-1).astype(jnp.int32)   # (B,)
    x0 = prompts.reshape(B * S, D).astype(jnp.float32)

    def full(shape):                     # whole array, same block every layer step
        n = len(shape)
        return pl.BlockSpec(shape, lambda l, e, n=n: (0,) * n)

    def stacked(shape):                  # per-layer slice of an (L, ...) stacked array
        n = len(shape)
        return pl.BlockSpec((None,) + shape, lambda l, e, n=n: (l,) + (0,) * n)

    gs = pltpu.PrefetchScalarGridSpec(
        num_scalar_prefetch=1,
        grid=(L,),
        in_specs=[
            full((B * S, D)),                        # x0 (prompts)
            full((S, D)),                            # positional embedding (broadcast in-kernel)
            stacked((1, D)), stacked((1, D)),        # ln1 w/b
            stacked((H, D, HD)), stacked((H, 1, HD)),   # wq, bq
            stacked((H, D, HD)), stacked((H, 1, HD)),   # wk, bk
            stacked((H, D, HD)), stacked((H, 1, HD)),   # wv, bv
            stacked((H, HD, D)), stacked((1, D)),       # wo, bo
            stacked((1, D)), stacked((1, D)),        # ln2 w/b
            stacked((D, 4 * D)), stacked((1, 4 * D)),   # mlp w1, b1
            stacked((4 * D, D)), stacked((1, D)),       # mlp w2, b2
            full((1, D)), full((1, D)), full((D, E)),   # ln_final w/b, text_projection
        ],
        out_specs=pl.BlockSpec((B, E), lambda l, e: (0, 0)),
        scratch_shapes=[pltpu.VMEM((B * S, D), jnp.float32)],
    )

    return pl.pallas_call(
        fused_kernel,
        grid_spec=gs,
        out_shape=jax.ShapeDtypeStruct((B, E), jnp.float32),
        compiler_params=pltpu.CompilerParams(
            dimension_semantics=("arbitrary",)),      # layer axis carries state
    )(eot, x0, params["pos"],
      params["ln1w"], params["ln1b"],
      params["wq"], params["bq"], params["wk"], params["bk"],
      params["wv"], params["bv"], params["wo"], params["bo"],
      params["ln2w"], params["ln2b"],
      params["w1"], params["b1"], params["w2"], params["b2"],
      params["lnfw"], params["lnfb"], params["proj"])


# ----------------------------------------------------------------------------
# Deterministic parameter init (per-head, pre-transposed (in, out) layout,
# stacked over layers with a leading L axis)
# ----------------------------------------------------------------------------
def init_params(key):
    ks = jax.random.split(key, 20)

    def nrm(k, shape, scale):
        return (scale * jax.random.normal(k, shape)).astype(jnp.float32)

    return {
        "pos":  nrm(ks[0], (S, D), 0.01),
        "lnfw": 1.0 + nrm(ks[1], (1, D), 0.01),
        "lnfb": nrm(ks[2], (1, D), 0.01),
        "proj": nrm(ks[3], (D, E), D ** -0.5),
        "ln1w": 1.0 + nrm(ks[4], (L, 1, D), 0.01),
        "ln1b": nrm(ks[5], (L, 1, D), 0.01),
        "wq":   nrm(ks[6], (L, H, D, HD), D ** -0.5),
        "bq":   nrm(ks[7], (L, H, 1, HD), 0.01),
        "wk":   nrm(ks[8], (L, H, D, HD), D ** -0.5),
        "bk":   nrm(ks[9], (L, H, 1, HD), 0.01),
        "wv":   nrm(ks[10], (L, H, D, HD), D ** -0.5),
        "bv":   nrm(ks[11], (L, H, 1, HD), 0.01),
        "wo":   nrm(ks[12], (L, H, HD, D), D ** -0.5),
        "bo":   nrm(ks[13], (L, 1, D), 0.01),
        "ln2w": 1.0 + nrm(ks[14], (L, 1, D), 0.01),
        "ln2b": nrm(ks[15], (L, 1, D), 0.01),
        "w1":   nrm(ks[16], (L, D, 4 * D), D ** -0.5),
        "b1":   nrm(ks[17], (L, 1, 4 * D), 0.01),
        "w2":   nrm(ks[18], (L, 4 * D, D), (4 * D) ** -0.5),
        "b2":   nrm(ks[19], (L, 1, D), 0.01),
    }


# ----------------------------------------------------------------------------
# Pure-JAX reference (same math) for the correctness check
# ----------------------------------------------------------------------------
def reference(prompts, tokenized, params):
    def ln(x, w, b):
        mu = x.mean(-1, keepdims=True)
        var = ((x - mu) ** 2).mean(-1, keepdims=True)
        return (x - mu) * jax.lax.rsqrt(var + EPS) * w + b

    x = prompts + params["pos"][None]
    allowed = jnp.arange(S)[None, :] <= jnp.arange(S)[:, None]
    scale = 1.0 / (HD ** 0.5)
    for l in range(L):
        xn = ln(x, params["ln1w"][l], params["ln1b"][l])
        q = jnp.einsum("bsd,hde->bshe", xn, params["wq"][l]) + params["bq"][l][:, 0][None, None]
        k = jnp.einsum("bsd,hde->bshe", xn, params["wk"][l]) + params["bk"][l][:, 0][None, None]
        v = jnp.einsum("bsd,hde->bshe", xn, params["wv"][l]) + params["bv"][l][:, 0][None, None]
        s = jnp.einsum("bqhe,bkhe->bhqk", q, k) * scale
        s = jnp.where(allowed[None, None], s, NEG)
        a = jax.nn.softmax(s, axis=-1)
        ao = jnp.einsum("bhqk,bkhe->bqhe", a, v)
        attn = jnp.einsum("bqhe,hed->bqd", ao, params["wo"][l]) + params["bo"][l]
        x = x + attn
        xn2 = ln(x, params["ln2w"][l], params["ln2b"][l])
        hdn = xn2 @ params["w1"][l] + params["b1"][l]
        hdn = hdn * jax.nn.sigmoid(1.702 * hdn)
        x = x + hdn @ params["w2"][l] + params["b2"][l]
    eot = jnp.argmax(tokenized, axis=-1)
    g = x[jnp.arange(B), eot]
    g = ln(g, params["lnfw"], params["lnfb"])
    return g @ params["proj"]


if __name__ == "__main__":
    key = jax.random.PRNGKey(0)
    kp, kx, kt = jax.random.split(key, 3)
    params = init_params(kp)

    prompts = (0.02 * jax.random.normal(kx, (B, S, D))).astype(jnp.float32)
    tokenized_prompts = jax.random.randint(kt, (B, S), 1, 100)
    # make the "EOT" (argmax) positions distinct per row
    tokenized_prompts = tokenized_prompts.at[0, 5].set(1000).at[1, 7].set(1000)

    encode = jax.jit(text_encoder)
    out = jax.block_until_ready(encode(prompts, tokenized_prompts, params))

    ref = reference(prompts, tokenized_prompts, params)
    assert out.shape == (B, E)
    # tolerance covers the approximate (EUP) softmax reciprocal in the kernel
    assert bool(jnp.allclose(out, ref, atol=5e-3, rtol=5e-3))
    print("KERNEL_OK")
</pallas_src>

<mosaic_0001>
module attributes {stable_mosaic.version = 11 : i64} {
  func.func @fused_kernel(%arg0: i32, %arg1: memref<2xi32, #tpu.memory_space<smem>>, %arg2: memref<16x32xf32, #tpu.memory_space<vmem>>, %arg3: memref<8x32xf32, #tpu.memory_space<vmem>>, %arg4: memref<1x1x32xf32, #tpu.memory_space<vmem>>, %arg5: memref<1x1x32xf32, #tpu.memory_space<vmem>>, %arg6: memref<1x4x32x8xf32, #tpu.memory_space<vmem>>, %arg7: memref<1x4x1x8xf32, #tpu.memory_space<vmem>>, %arg8: memref<1x4x32x8xf32, #tpu.memory_space<vmem>>, %arg9: memref<1x4x1x8xf32, #tpu.memory_space<vmem>>, %arg10: memref<1x4x32x8xf32, #tpu.memory_space<vmem>>, %arg11: memref<1x4x1x8xf32, #tpu.memory_space<vmem>>, %arg12: memref<1x4x8x32xf32, #tpu.memory_space<vmem>>, %arg13: memref<1x1x32xf32, #tpu.memory_space<vmem>>, %arg14: memref<1x1x32xf32, #tpu.memory_space<vmem>>, %arg15: memref<1x1x32xf32, #tpu.memory_space<vmem>>, %arg16: memref<1x32x128xf32, #tpu.memory_space<vmem>>, %arg17: memref<1x1x128xf32, #tpu.memory_space<vmem>>, %arg18: memref<1x128x32xf32, #tpu.memory_space<vmem>>, %arg19: memref<1x1x32xf32, #tpu.memory_space<vmem>>, %arg20: memref<1x32xf32, #tpu.memory_space<vmem>>, %arg21: memref<1x32xf32, #tpu.memory_space<vmem>>, %arg22: memref<32x16xf32, #tpu.memory_space<vmem>>, %arg23: memref<2x16xf32, #tpu.memory_space<vmem>>, %arg24: memref<16x32xf32, #tpu.memory_space<vmem>>) attributes {dimension_semantics = [#tpu.dimension_semantics<arbitrary>], iteration_bounds = array<i64: 2>, scalar_prefetch = 1 : i64, scratch_operands = 1 : i64, tpu.core_type = #tpu.core_type<tc>, window_params = [{pipeline_mode = #tpu.pipeline_mode<synchronous>, transform_indices = @transform_0, window_bounds = array<i64: 16, 32>}, {pipeline_mode = #tpu.pipeline_mode<synchronous>, transform_indices = @transform_1, window_bounds = array<i64: 8, 32>}, {transform_indices = @transform_2, window_bounds = array<i64: 1, 1, 32>}, {transform_indices = @transform_3, window_bounds = array<i64: 1, 1, 32>}, {transform_indices = @transform_4, window_bounds = array<i64: 1, 4, 32, 8>}, {transform_indices = @transform_5, window_bounds = array<i64: 1, 4, 1, 8>}, {transform_indices = @transform_6, window_bounds = array<i64: 1, 4, 32, 8>}, {transform_indices = @transform_7, window_bounds = array<i64: 1, 4, 1, 8>}, {transform_indices = @transform_8, window_bounds = array<i64: 1, 4, 32, 8>}, {transform_indices = @transform_9, window_bounds = array<i64: 1, 4, 1, 8>}, {transform_indices = @transform_10, window_bounds = array<i64: 1, 4, 8, 32>}, {transform_indices = @transform_11, window_bounds = array<i64: 1, 1, 32>}, {transform_indices = @transform_12, window_bounds = array<i64: 1, 1, 32>}, {transform_indices = @transform_13, window_bounds = array<i64: 1, 1, 32>}, {transform_indices = @transform_14, window_bounds = array<i64: 1, 32, 128>}, {transform_indices = @transform_15, window_bounds = array<i64: 1, 1, 128>}, {transform_indices = @transform_16, window_bounds = array<i64: 1, 128, 32>}, {transform_indices = @transform_17, window_bounds = array<i64: 1, 1, 32>}, {pipeline_mode = #tpu.pipeline_mode<synchronous>, transform_indices = @transform_18, window_bounds = array<i64: 1, 32>}, {pipeline_mode = #tpu.pipeline_mode<synchronous>, transform_indices = @transform_19, window_bounds = array<i64: 1, 32>}, {pipeline_mode = #tpu.pipeline_mode<synchronous>, transform_indices = @transform_20, window_bounds = array<i64: 32, 16>}, {pipeline_mode = #tpu.pipeline_mode<synchronous>, transform_indices = @transform_21, window_bounds = array<i64: 2, 16>}]} {
    %c0_i32 = arith.constant 0 : i32
    %0 = arith.cmpi eq, %arg0, %c0_i32 : i32
    %1 = arith.extui %0 : i1 to i32
    %c0_i32_0 = arith.constant 0 : i32
    %2 = arith.cmpi ne, %1, %c0_i32_0 : i32
    scf.if %2 {
      %c0_195 = arith.constant 0 : index
      %c0_196 = arith.constant 0 : index
      %281 = vector.load %arg2[%c0_195, %c0_196] : memref<16x32xf32, #tpu.memory_space<vmem>>, vector<16x32xf32>
      %282 = vector.shape_cast %281 : vector<16x32xf32> to vector<2x8x32xf32>
      %c0_197 = arith.constant 0 : index
      %c0_198 = arith.constant 0 : index
      %283 = vector.load %arg3[%c0_197, %c0_198] : memref<8x32xf32, #tpu.memory_space<vmem>>, vector<8x32xf32>
      %284 = vector.shape_cast %283 : vector<8x32xf32> to vector<1x8x32xf32>
      %285 = vector.broadcast %284 : vector<1x8x32xf32> to vector<2x8x32xf32>
      %286 = arith.addf %282, %285 : vector<2x8x32xf32>
      %287 = vector.shape_cast %286 : vector<2x8x32xf32> to vector<16x32xf32>
      %c0_199 = arith.constant 0 : index
      %c0_200 = arith.constant 0 : index
      %288 = vector.load %arg24[%c0_199, %c0_200] : memref<16x32xf32, #tpu.memory_space<vmem>>, vector<16x32xf32>
      tpu.vector_store %arg24[%c0_199, %c0_200], %287 {strides = array<i32>} : memref<16x32xf32, #tpu.memory_space<vmem>>, vector<16x32xf32>,
    } else {
    }
    %c0 = arith.constant 0 : index
    %c0_1 = arith.constant 0 : index
    %3 = vector.load %arg24[%c0, %c0_1] : memref<16x32xf32, #tpu.memory_space<vmem>>, vector<16x32xf32>
    %c0_2 = arith.constant 0 : index
    %c0_3 = arith.constant 0 : index
    %c0_4 = arith.constant 0 : index
    %4 = vector.load %arg4[%c0_2, %c0_3, %c0_4] : memref<1x1x32xf32, #tpu.memory_space<vmem>>, vector<1x1x32xf32>
    %5 = vector.shape_cast %4 : vector<1x1x32xf32> to vector<1x32xf32>
    %c0_5 = arith.constant 0 : index
    %c0_6 = arith.constant 0 : index
    %c0_7 = arith.constant 0 : index
    %6 = vector.load %arg5[%c0_5, %c0_6, %c0_7] : memref<1x1x32xf32, #tpu.memory_space<vmem>>, vector<1x1x32xf32>
    %7 = vector.shape_cast %6 : vector<1x1x32xf32> to vector<1x32xf32>
    %cst = arith.constant dense<0.000000e+00> : vector<16xf32>
    %8 = vector.multi_reduction <add>, %3, %cst [1] : vector<16x32xf32> to vector<16xf32>
    %9 = vector.shape_cast %8 : vector<16xf32> to vector<16x1xf32>
    %cst_8 = arith.constant 3.200000e+01 : f32
    %10 = vector.broadcast %cst_8 : f32 to vector<16x1xf32>
    %11 = arith.divf %9, %10 : vector<16x1xf32>
    %12 = vector.broadcast %11 : vector<16x1xf32> to vector<16x32xf32>
    %13 = arith.subf %3, %12 : vector<16x32xf32>
    %14 = arith.mulf %13, %13 : vector<16x32xf32>
    %cst_9 = arith.constant dense<0.000000e+00> : vector<16xf32>
    %15 = vector.multi_reduction <add>, %14, %cst_9 [1] : vector<16x32xf32> to vector<16xf32>
    %16 = vector.shape_cast %15 : vector<16xf32> to vector<16x1xf32>
    %cst_10 = arith.constant 3.200000e+01 : f32
    %17 = vector.broadcast %cst_10 : f32 to vector<16x1xf32>
    %18 = arith.divf %16, %17 : vector<16x1xf32>
    %19 = vector.broadcast %11 : vector<16x1xf32> to vector<16x32xf32>
    %20 = arith.subf %3, %19 : vector<16x32xf32>
    %cst_11 = arith.constant 9.99999974E-6 : f32
    %21 = vector.broadcast %cst_11 : f32 to vector<16x1xf32>
    %22 = arith.addf %18, %21 : vector<16x1xf32>
    %23 = math.rsqrt %22 : vector<16x1xf32>
    %24 = vector.broadcast %23 : vector<16x1xf32> to vector<16x32xf32>
    %25 = arith.mulf %20, %24 : vector<16x32xf32>
    %26 = vector.broadcast %5 : vector<1x32xf32> to vector<16x32xf32>
    %27 = arith.mulf %25, %26 : vector<16x32xf32>
    %28 = vector.broadcast %7 : vector<1x32xf32> to vector<16x32xf32>
    %29 = arith.addf %27, %28 : vector<16x32xf32>
    %30 = tpu.iota {dimensions = array<i32: 0>} : vector<8x8xi32>
    %31 = tpu.iota {dimensions = array<i32: 1>} : vector<8x8xi32>
    %32 = arith.cmpi sle, %31, %30 : vector<8x8xi32>
    %33 = vector.shape_cast %32 : vector<8x8xi1> to vector<1x8x8xi1>
    %cst_12 = arith.constant 0.000000e+00 : f32
    %34 = vector.broadcast %cst_12 : f32 to vector<16x32xf32>
    %c0_13 = arith.constant 0 : index
    %c0_14 = arith.constant 0 : index
    %c0_15 = arith.constant 0 : index
    %c0_16 = arith.constant 0 : index
    %35 = vector.load %arg6[%c0_13, %c0_14, %c0_15, %c0_16] : memref<1x4x32x8xf32, #tpu.memory_space<vmem>>, vector<1x1x32x8xf32>
    %36 = vector.shape_cast %35 : vector<1x1x32x8xf32> to vector<32x8xf32>
    %cst_17 = arith.constant dense<0.000000e+00> : vector<16x8xf32>
    %37 = tpu.matmul %29, %36, %cst_17 {dimension_numbers = #tpu.dot_dimension_numbers<[1], [0], [0], [1], [0, 0, 1, 1], [], []>} : vector<16x32xf32>, vector<32x8xf32>, vector<16x8xf32> -> vector<16x8xf32>
    %c0_18 = arith.constant 0 : index
    %c0_19 = arith.constant 0 : index
    %c0_20 = arith.constant 0 : index
    %c0_21 = arith.constant 0 : index
    %38 = vector.load %arg7[%c0_18, %c0_19, %c0_20, %c0_21] : memref<1x4x1x8xf32, #tpu.memory_space<vmem>>, vector<1x1x1x8xf32>
    %39 = vector.shape_cast %38 : vector<1x1x1x8xf32> to vector<1x8xf32>
    %40 = vector.broadcast %39 : vector<1x8xf32> to vector<16x8xf32>
    %41 = arith.addf %37, %40 : vector<16x8xf32>
    %cst_22 = arith.constant 0.353553385 : f32
    %42 = vector.broadcast %cst_22 : f32 to vector<16x8xf32>
    %43 = arith.mulf %41, %42 : vector<16x8xf32>
    %c0_23 = arith.constant 0 : index
    %c0_24 = arith.constant 0 : index
    %c0_25 = arith.constant 0 : index
    %c0_26 = arith.constant 0 : index
    %44 = vector.load %arg8[%c0_23, %c0_24, %c0_25, %c0_26] : memref<1x4x32x8xf32, #tpu.memory_space<vmem>>, vector<1x1x32x8xf32>
    %45 = vector.shape_cast %44 : vector<1x1x32x8xf32> to vector<32x8xf32>
    %cst_27 = arith.constant dense<0.000000e+00> : vector<16x8xf32>
    %46 = tpu.matmul %29, %45, %cst_27 {dimension_numbers = #tpu.dot_dimension_numbers<[1], [0], [0], [1], [0, 0, 1, 1], [], []>} : vector<16x32xf32>, vector<32x8xf32>, vector<16x8xf32> -> vector<16x8xf32>
    %c0_28 = arith.constant 0 : index
    %c0_29 = arith.constant 0 : index
    %c0_30 = arith.constant 0 : index
    %c0_31 = arith.constant 0 : index
    %47 = vector.load %arg9[%c0_28, %c0_29, %c0_30, %c0_31] : memref<1x4x1x8xf32, #tpu.memory_space<vmem>>, vector<1x1x1x8xf32>
    %48 = vector.shape_cast %47 : vector<1x1x1x8xf32> to vector<1x8xf32>
    %49 = vector.broadcast %48 : vector<1x8xf32> to vector<16x8xf32>
    %50 = arith.addf %46, %49 : vector<16x8xf32>
    %c0_32 = arith.constant 0 : index
    %c0_33 = arith.constant 0 : index
    %c0_34 = arith.constant 0 : index
    %c0_35 = arith.constant 0 : index
    %51 = vector.load %arg10[%c0_32, %c0_33, %c0_34, %c0_35] : memref<1x4x32x8xf32, #tpu.memory_space<vmem>>, vector<1x1x32x8xf32>
    %52 = vector.shape_cast %51 : vector<1x1x32x8xf32> to vector<32x8xf32>
    %cst_36 = arith.constant dense<0.000000e+00> : vector<16x8xf32>
    %53 = tpu.matmul %29, %52, %cst_36 {dimension_numbers = #tpu.dot_dimension_numbers<[1], [0], [0], [1], [0, 0, 1, 1], [], []>} : vector<16x32xf32>, vector<32x8xf32>, vector<16x8xf32> -> vector<16x8xf32>
    %c0_37 = arith.constant 0 : index
    %c0_38 = arith.constant 0 : index
    %c0_39 = arith.constant 0 : index
    %c0_40 = arith.constant 0 : index
    %54 = vector.load %arg11[%c0_37, %c0_38, %c0_39, %c0_40] : memref<1x4x1x8xf32, #tpu.memory_space<vmem>>, vector<1x1x1x8xf32>
    %55 = vector.shape_cast %54 : vector<1x1x1x8xf32> to vector<1x8xf32>
    %56 = vector.broadcast %55 : vector<1x8xf32> to vector<16x8xf32>
    %57 = arith.addf %53, %56 : vector<16x8xf32>
    %58 = vector.shape_cast %43 : vector<16x8xf32> to vector<2x8x8xf32>
    %59 = vector.shape_cast %50 : vector<16x8xf32> to vector<2x8x8xf32>
    %60 = vector.shape_cast %57 : vector<16x8xf32> to vector<2x8x8xf32>
    "tpu.trace_start"() <{level = 10 : i32, message = "bqe,bke->bqk"}> : () -> ()
    %cst_41 = arith.constant dense<0.000000e+00> : vector<2x8x8xf32>
    %61 = tpu.matmul %58, %59, %cst_41 {dimension_numbers = #tpu.dot_dimension_numbers<[2], [2], [1], [1], [0, 0, 0, 1, 1, 1], [0], [0]>} : vector<2x8x8xf32>, vector<2x8x8xf32>, vector<2x8x8xf32> -> vector<2x8x8xf32>
    %cst_42 = arith.constant -1.000000e+30 : f32
    "tpu.trace_stop"() : () -> ()
    %62 = vector.shape_cast %33 : vector<1x8x8xi1> to vector<1x8x8xi1>
    %63 = vector.broadcast %62 : vector<1x8x8xi1> to vector<2x8x8xi1>
    %64 = vector.broadcast %cst_42 : f32 to vector<2x8x8xf32>
    %65 = arith.select %63, %61, %64 : vector<2x8x8xi1>, vector<2x8x8xf32>
    %cst_43 = arith.constant dense<0xFF800000> : vector<2x8xf32>
    %66 = vector.multi_reduction <maximumf>, %65, %cst_43 [2] : vector<2x8x8xf32> to vector<2x8xf32>
    %67 = vector.shape_cast %66 : vector<2x8xf32> to vector<2x8x1xf32>
    %68 = vector.broadcast %67 : vector<2x8x1xf32> to vector<2x8x8xf32>
    %69 = arith.subf %65, %68 : vector<2x8x8xf32>
    %70 = math.exp %69 : vector<2x8x8xf32>
    %cst_44 = arith.constant dense<0.000000e+00> : vector<2x8xf32>
    %71 = vector.multi_reduction <add>, %70, %cst_44 [2] : vector<2x8x8xf32> to vector<2x8xf32>
    %72 = vector.shape_cast %71 : vector<2x8xf32> to vector<2x8x1xf32>
    %73 = tpu.reciprocal %72 {approx = true} : vector<2x8x1xf32> -> vector<2x8x1xf32>
    %74 = vector.broadcast %73 : vector<2x8x1xf32> to vector<2x8x8xf32>
    %75 = arith.mulf %70, %74 : vector<2x8x8xf32>
    "tpu.trace_start"() <{level = 10 : i32, message = "bqk,bke->bqe"}> : () -> ()
    %cst_45 = arith.constant dense<0.000000e+00> : vector<2x8x8xf32>
    %76 = tpu.matmul %75, %60, %cst_45 {dimension_numbers = #tpu.dot_dimension_numbers<[2], [1], [1], [2], [0, 0, 0, 1, 1, 2], [0], [0]>} : vector<2x8x8xf32>, vector<2x8x8xf32>, vector<2x8x8xf32> -> vector<2x8x8xf32>
    "tpu.trace_stop"() : () -> ()
    %77 = vector.shape_cast %76 : vector<2x8x8xf32> to vector<16x8xf32>
    %c0_46 = arith.constant 0 : index
    %c0_47 = arith.constant 0 : index
    %c0_48 = arith.constant 0 : index
    %c0_49 = arith.constant 0 : index
    %78 = vector.load %arg12[%c0_46, %c0_47, %c0_48, %c0_49] : memref<1x4x8x32xf32, #tpu.memory_space<vmem>>, vector<1x1x8x32xf32>
    %79 = vector.shape_cast %78 : vector<1x1x8x32xf32> to vector<8x32xf32>
    %cst_50 = arith.constant dense<0.000000e+00> : vector<16x32xf32>
    %80 = tpu.matmul %77, %79, %cst_50 {dimension_numbers = #tpu.dot_dimension_numbers<[1], [0], [0], [1], [0, 0, 1, 1], [], []>} : vector<16x8xf32>, vector<8x32xf32>, vector<16x32xf32> -> vector<16x32xf32>
    %81 = arith.addf %34, %80 : vector<16x32xf32>
    %c0_51 = arith.constant 0 : index
    %c1 = arith.constant 1 : index
    %c0_52 = arith.constant 0 : index
    %c0_53 = arith.constant 0 : index
    %82 = vector.load %arg6[%c0_51, %c1, %c0_52, %c0_53] : memref<1x4x32x8xf32, #tpu.memory_space<vmem>>, vector<1x1x32x8xf32>
    %83 = vector.shape_cast %82 : vector<1x1x32x8xf32> to vector<32x8xf32>
    %cst_54 = arith.constant dense<0.000000e+00> : vector<16x8xf32>
    %84 = tpu.matmul %29, %83, %cst_54 {dimension_numbers = #tpu.dot_dimension_numbers<[1], [0], [0], [1], [0, 0, 1, 1], [], []>} : vector<16x32xf32>, vector<32x8xf32>, vector<16x8xf32> -> vector<16x8xf32>
    %c0_55 = arith.constant 0 : index
    %c1_56 = arith.constant 1 : index
    %c0_57 = arith.constant 0 : index
    %c0_58 = arith.constant 0 : index
    %85 = vector.load %arg7[%c0_55, %c1_56, %c0_57, %c0_58] : memref<1x4x1x8xf32, #tpu.memory_space<vmem>>, vector<1x1x1x8xf32>
    %86 = vector.shape_cast %85 : vector<1x1x1x8xf32> to vector<1x8xf32>
    %87 = vector.broadcast %86 : vector<1x8xf32> to vector<16x8xf32>
    %88 = arith.addf %84, %87 : vector<16x8xf32>
    %cst_59 = arith.constant 0.353553385 : f32
    %89 = vector.broadcast %cst_59 : f32 to vector<16x8xf32>
    %90 = arith.mulf %88, %89 : vector<16x8xf32>
    %c0_60 = arith.constant 0 : index
    %c1_61 = arith.constant 1 : index
    %c0_62 = arith.constant 0 : index
    %c0_63 = arith.constant 0 : index
    %91 = vector.load %arg8[%c0_60, %c1_61, %c0_62, %c0_63] : memref<1x4x32x8xf32, #tpu.memory_space<vmem>>, vector<1x1x32x8xf32>
    %92 = vector.shape_cast %91 : vector<1x1x32x8xf32> to vector<32x8xf32>
    %cst_64 = arith.constant dense<0.000000e+00> : vector<16x8xf32>
    %93 = tpu.matmul %29, %92, %cst_64 {dimension_numbers = #tpu.dot_dimension_numbers<[1], [0], [0], [1], [0, 0, 1, 1], [], []>} : vector<16x32xf32>, vector<32x8xf32>, vector<16x8xf32> -> vector<16x8xf32>
    %c0_65 = arith.constant 0 : index
    %c1_66 = arith.constant 1 : index
    %c0_67 = arith.constant 0 : index
    %c0_68 = arith.constant 0 : index
    %94 = vector.load %arg9[%c0_65, %c1_66, %c0_67, %c0_68] : memref<1x4x1x8xf32, #tpu.memory_space<vmem>>, vector<1x1x1x8xf32>
    %95 = vector.shape_cast %94 : vector<1x1x1x8xf32> to vector<1x8xf32>
    %96 = vector.broadcast %95 : vector<1x8xf32> to vector<16x8xf32>
    %97 = arith.addf %93, %96 : vector<16x8xf32>
    %c0_69 = arith.constant 0 : index
    %c1_70 = arith.constant 1 : index
    %c0_71 = arith.constant 0 : index
    %c0_72 = arith.constant 0 : index
    %98 = vector.load %arg10[%c0_69, %c1_70, %c0_71, %c0_72] : memref<1x4x32x8xf32, #tpu.memory_space<vmem>>, vector<1x1x32x8xf32>
    %99 = vector.shape_cast %98 : vector<1x1x32x8xf32> to vector<32x8xf32>
    %cst_73 = arith.constant dense<0.000000e+00> : vector<16x8xf32>
    %100 = tpu.matmul %29, %99, %cst_73 {dimension_numbers = #tpu.dot_dimension_numbers<[1], [0], [0], [1], [0, 0, 1, 1], [], []>} : vector<16x32xf32>, vector<32x8xf32>, vector<16x8xf32> -> vector<16x8xf32>
    %c0_74 = arith.constant 0 : index
    %c1_75 = arith.constant 1 : index
    %c0_76 = arith.constant 0 : index
    %c0_77 = arith.constant 0 : index
    %101 = vector.load %arg11[%c0_74, %c1_75, %c0_76, %c0_77] : memref<1x4x1x8xf32, #tpu.memory_space<vmem>>, vector<1x1x1x8xf32>
    %102 = vector.shape_cast %101 : vector<1x1x1x8xf32> to vector<1x8xf32>
    %103 = vector.broadcast %102 : vector<1x8xf32> to vector<16x8xf32>
    %104 = arith.addf %100, %103 : vector<16x8xf32>
    %105 = vector.shape_cast %90 : vector<16x8xf32> to vector<2x8x8xf32>
    %106 = vector.shape_cast %97 : vector<16x8xf32> to vector<2x8x8xf32>
    %107 = vector.shape_cast %104 : vector<16x8xf32> to vector<2x8x8xf32>
    "tpu.trace_start"() <{level = 10 : i32, message = "bqe,bke->bqk"}> : () -> ()
    %cst_78 = arith.constant dense<0.000000e+00> : vector<2x8x8xf32>
    %108 = tpu.matmul %105, %106, %cst_78 {dimension_numbers = #tpu.dot_dimension_numbers<[2], [2], [1], [1], [0, 0, 0, 1, 1, 1], [0], [0]>} : vector<2x8x8xf32>, vector<2x8x8xf32>, vector<2x8x8xf32> -> vector<2x8x8xf32>
    %cst_79 = arith.constant -1.000000e+30 : f32
    "tpu.trace_stop"() : () -> ()
    %109 = vector.shape_cast %33 : vector<1x8x8xi1> to vector<1x8x8xi1>
    %110 = vector.broadcast %109 : vector<1x8x8xi1> to vector<2x8x8xi1>
    %111 = vector.broadcast %cst_79 : f32 to vector<2x8x8xf32>
    %112 = arith.select %110, %108, %111 : vector<2x8x8xi1>, vector<2x8x8xf32>
    %cst_80 = arith.constant dense<0xFF800000> : vector<2x8xf32>
    %113 = vector.multi_reduction <maximumf>, %112, %cst_80 [2] : vector<2x8x8xf32> to vector<2x8xf32>
    %114 = vector.shape_cast %113 : vector<2x8xf32> to vector<2x8x1xf32>
    %115 = vector.broadcast %114 : vector<2x8x1xf32> to vector<2x8x8xf32>
    %116 = arith.subf %112, %115 : vector<2x8x8xf32>
    %117 = math.exp %116 : vector<2x8x8xf32>
    %cst_81 = arith.constant dense<0.000000e+00> : vector<2x8xf32>
    %118 = vector.multi_reduction <add>, %117, %cst_81 [2] : vector<2x8x8xf32> to vector<2x8xf32>
    %119 = vector.shape_cast %118 : vector<2x8xf32> to vector<2x8x1xf32>
    %120 = tpu.reciprocal %119 {approx = true} : vector<2x8x1xf32> -> vector<2x8x1xf32>
    %121 = vector.broadcast %120 : vector<2x8x1xf32> to vector<2x8x8xf32>
    %122 = arith.mulf %117, %121 : vector<2x8x8xf32>
    "tpu.trace_start"() <{level = 10 : i32, message = "bqk,bke->bqe"}> : () -> ()
    %cst_82 = arith.constant dense<0.000000e+00> : vector<2x8x8xf32>
    %123 = tpu.matmul %122, %107, %cst_82 {dimension_numbers = #tpu.dot_dimension_numbers<[2], [1], [1], [2], [0, 0, 0, 1, 1, 2], [0], [0]>} : vector<2x8x8xf32>, vector<2x8x8xf32>, vector<2x8x8xf32> -> vector<2x8x8xf32>
    "tpu.trace_stop"() : () -> ()
    %124 = vector.shape_cast %123 : vector<2x8x8xf32> to vector<16x8xf32>
    %c0_83 = arith.constant 0 : index
    %c1_84 = arith.constant 1 : index
    %c0_85 = arith.constant 0 : index
    %c0_86 = arith.constant 0 : index
    %125 = vector.load %arg12[%c0_83, %c1_84, %c0_85, %c0_86] : memref<1x4x8x32xf32, #tpu.memory_space<vmem>>, vector<1x1x8x32xf32>
    %126 = vector.shape_cast %125 : vector<1x1x8x32xf32> to vector<8x32xf32>
    %cst_87 = arith.constant dense<0.000000e+00> : vector<16x32xf32>
    %127 = tpu.matmul %124, %126, %cst_87 {dimension_numbers = #tpu.dot_dimension_numbers<[1], [0], [0], [1], [0, 0, 1, 1], [], []>} : vector<16x8xf32>, vector<8x32xf32>, vector<16x32xf32> -> vector<16x32xf32>
    %128 = arith.addf %81, %127 : vector<16x32xf32>
    %c0_88 = arith.constant 0 : index
    %c2 = arith.constant 2 : index
    %c0_89 = arith.constant 0 : index
    %c0_90 = arith.constant 0 : index
    %129 = vector.load %arg6[%c0_88, %c2, %c0_89, %c0_90] : memref<1x4x32x8xf32, #tpu.memory_space<vmem>>, vector<1x1x32x8xf32>
    %130 = vector.shape_cast %129 : vector<1x1x32x8xf32> to vector<32x8xf32>
    %cst_91 = arith.constant dense<0.000000e+00> : vector<16x8xf32>
    %131 = tpu.matmul %29, %130, %cst_91 {dimension_numbers = #tpu.dot_dimension_numbers<[1], [0], [0], [1], [0, 0, 1, 1], [], []>} : vector<16x32xf32>, vector<32x8xf32>, vector<16x8xf32> -> vector<16x8xf32>
    %c0_92 = arith.constant 0 : index
    %c2_93 = arith.constant 2 : index
    %c0_94 = arith.constant 0 : index
    %c0_95 = arith.constant 0 : index
    %132 = vector.load %arg7[%c0_92, %c2_93, %c0_94, %c0_95] : memref<1x4x1x8xf32, #tpu.memory_space<vmem>>, vector<1x1x1x8xf32>
    %133 = vector.shape_cast %132 : vector<1x1x1x8xf32> to vector<1x8xf32>
    %134 = vector.broadcast %133 : vector<1x8xf32> to vector<16x8xf32>
    %135 = arith.addf %131, %134 : vector<16x8xf32>
    %cst_96 = arith.constant 0.353553385 : f32
    %136 = vector.broadcast %cst_96 : f32 to vector<16x8xf32>
    %137 = arith.mulf %135, %136 : vector<16x8xf32>
    %c0_97 = arith.constant 0 : index
    %c2_98 = arith.constant 2 : index
    %c0_99 = arith.constant 0 : index
    %c0_100 = arith.constant 0 : index
    %138 = vector.load %arg8[%c0_97, %c2_98, %c0_99, %c0_100] : memref<1x4x32x8xf32, #tpu.memory_space<vmem>>, vector<1x1x32x8xf32>
    %139 = vector.shape_cast %138 : vector<1x1x32x8xf32> to vector<32x8xf32>
    %cst_101 = arith.constant dense<0.000000e+00> : vector<16x8xf32>
    %140 = tpu.matmul %29, %139, %cst_101 {dimension_numbers = #tpu.dot_dimension_numbers<[1], [0], [0], [1], [0, 0, 1, 1], [], []>} : vector<16x32xf32>, vector<32x8xf32>, vector<16x8xf32> -> vector<16x8xf32>
    %c0_102 = arith.constant 0 : index
    %c2_103 = arith.constant 2 : index
    %c0_104 = arith.constant 0 : index
    %c0_105 = arith.constant 0 : index
    %141 = vector.load %arg9[%c0_102, %c2_103, %c0_104, %c0_105] : memref<1x4x1x8xf32, #tpu.memory_space<vmem>>, vector<1x1x1x8xf32>
    %142 = vector.shape_cast %141 : vector<1x1x1x8xf32> to vector<1x8xf32>
    %143 = vector.broadcast %142 : vector<1x8xf32> to vector<16x8xf32>
    %144 = arith.addf %140, %143 : vector<16x8xf32>
    %c0_106 = arith.constant 0 : index
    %c2_107 = arith.constant 2 : index
    %c0_108 = arith.constant 0 : index
    %c0_109 = arith.constant 0 : index
    %145 = vector.load %arg10[%c0_106, %c2_107, %c0_108, %c0_109] : memref<1x4x32x8xf32, #tpu.memory_space<vmem>>, vector<1x1x32x8xf32>
    %146 = vector.shape_cast %145 : vector<1x1x32x8xf32> to vector<32x8xf32>
    %cst_110 = arith.constant dense<0.000000e+00> : vector<16x8xf32>
    %147 = tpu.matmul %29, %146, %cst_110 {dimension_numbers = #tpu.dot_dimension_numbers<[1], [0], [0], [1], [0, 0, 1, 1], [], []>} : vector<16x32xf32>, vector<32x8xf32>, vector<16x8xf32> -> vector<16x8xf32>
    %c0_111 = arith.constant 0 : index
    %c2_112 = arith.constant 2 : index
    %c0_113 = arith.constant 0 : index
    %c0_114 = arith.constant 0 : index
    %148 = vector.load %arg11[%c0_111, %c2_112, %c0_113, %c0_114] : memref<1x4x1x8xf32, #tpu.memory_space<vmem>>, vector<1x1x1x8xf32>
    %149 = vector.shape_cast %148 : vector<1x1x1x8xf32> to vector<1x8xf32>
    %150 = vector.broadcast %149 : vector<1x8xf32> to vector<16x8xf32>
    %151 = arith.addf %147, %150 : vector<16x8xf32>
    %152 = vector.shape_cast %137 : vector<16x8xf32> to vector<2x8x8xf32>
    %153 = vector.shape_cast %144 : vector<16x8xf32> to vector<2x8x8xf32>
    %154 = vector.shape_cast %151 : vector<16x8xf32> to vector<2x8x8xf32>
    "tpu.trace_start"() <{level = 10 : i32, message = "bqe,bke->bqk"}> : () -> ()
    %cst_115 = arith.constant dense<0.000000e+00> : vector<2x8x8xf32>
    %155 = tpu.matmul %152, %153, %cst_115 {dimension_numbers = #tpu.dot_dimension_numbers<[2], [2], [1], [1], [0, 0, 0, 1, 1, 1], [0], [0]>} : vector<2x8x8xf32>, vector<2x8x8xf32>, vector<2x8x8xf32> -> vector<2x8x8xf32>
    %cst_116 = arith.constant -1.000000e+30 : f32
    "tpu.trace_stop"() : () -> ()
    %156 = vector.shape_cast %33 : vector<1x8x8xi1> to vector<1x8x8xi1>
    %157 = vector.broadcast %156 : vector<1x8x8xi1> to vector<2x8x8xi1>
    %158 = vector.broadcast %cst_116 : f32 to vector<2x8x8xf32>
    %159 = arith.select %157, %155, %158 : vector<2x8x8xi1>, vector<2x8x8xf32>
    %cst_117 = arith.constant dense<0xFF800000> : vector<2x8xf32>
    %160 = vector.multi_reduction <maximumf>, %159, %cst_117 [2] : vector<2x8x8xf32> to vector<2x8xf32>
    %161 = vector.shape_cast %160 : vector<2x8xf32> to vector<2x8x1xf32>
    %162 = vector.broadcast %161 : vector<2x8x1xf32> to vector<2x8x8xf32>
    %163 = arith.subf %159, %162 : vector<2x8x8xf32>
    %164 = math.exp %163 : vector<2x8x8xf32>
    %cst_118 = arith.constant dense<0.000000e+00> : vector<2x8xf32>
    %165 = vector.multi_reduction <add>, %164, %cst_118 [2] : vector<2x8x8xf32> to vector<2x8xf32>
    %166 = vector.shape_cast %165 : vector<2x8xf32> to vector<2x8x1xf32>
    %167 = tpu.reciprocal %166 {approx = true} : vector<2x8x1xf32> -> vector<2x8x1xf32>
    %168 = vector.broadcast %167 : vector<2x8x1xf32> to vector<2x8x8xf32>
    %169 = arith.mulf %164, %168 : vector<2x8x8xf32>
    "tpu.trace_start"() <{level = 10 : i32, message = "bqk,bke->bqe"}> : () -> ()
    %cst_119 = arith.constant dense<0.000000e+00> : vector<2x8x8xf32>
    %170 = tpu.matmul %169, %154, %cst_119 {dimension_numbers = #tpu.dot_dimension_numbers<[2], [1], [1], [2], [0, 0, 0, 1, 1, 2], [0], [0]>} : vector<2x8x8xf32>, vector<2x8x8xf32>, vector<2x8x8xf32> -> vector<2x8x8xf32>
    "tpu.trace_stop"() : () -> ()
    %171 = vector.shape_cast %170 : vector<2x8x8xf32> to vector<16x8xf32>
    %c0_120 = arith.constant 0 : index
    %c2_121 = arith.constant 2 : index
    %c0_122 = arith.constant 0 : index
    %c0_123 = arith.constant 0 : index
    %172 = vector.load %arg12[%c0_120, %c2_121, %c0_122, %c0_123] : memref<1x4x8x32xf32, #tpu.memory_space<vmem>>, vector<1x1x8x32xf32>
    %173 = vector.shape_cast %172 : vector<1x1x8x32xf32> to vector<8x32xf32>
    %cst_124 = arith.constant dense<0.000000e+00> : vector<16x32xf32>
    %174 = tpu.matmul %171, %173, %cst_124 {dimension_numbers = #tpu.dot_dimension_numbers<[1], [0], [0], [1], [0, 0, 1, 1], [], []>} : vector<16x8xf32>, vector<8x32xf32>, vector<16x32xf32> -> vector<16x32xf32>
    %175 = arith.addf %128, %174 : vector<16x32xf32>
    %c0_125 = arith.constant 0 : index
    %c3 = arith.constant 3 : index
    %c0_126 = arith.constant 0 : index
    %c0_127 = arith.constant 0 : index
    %176 = vector.load %arg6[%c0_125, %c3, %c0_126, %c0_127] : memref<1x4x32x8xf32, #tpu.memory_space<vmem>>, vector<1x1x32x8xf32>
    %177 = vector.shape_cast %176 : vector<1x1x32x8xf32> to vector<32x8xf32>
    %cst_128 = arith.constant dense<0.000000e+00> : vector<16x8xf32>
    %178 = tpu.matmul %29, %177, %cst_128 {dimension_numbers = #tpu.dot_dimension_numbers<[1], [0], [0], [1], [0, 0, 1, 1], [], []>} : vector<16x32xf32>, vector<32x8xf32>, vector<16x8xf32> -> vector<16x8xf32>
    %c0_129 = arith.constant 0 : index
    %c3_130 = arith.constant 3 : index
    %c0_131 = arith.constant 0 : index
    %c0_132 = arith.constant 0 : index
    %179 = vector.load %arg7[%c0_129, %c3_130, %c0_131, %c0_132] : memref<1x4x1x8xf32, #tpu.memory_space<vmem>>, vector<1x1x1x8xf32>
    %180 = vector.shape_cast %179 : vector<1x1x1x8xf32> to vector<1x8xf32>
    %181 = vector.broadcast %180 : vector<1x8xf32> to vector<16x8xf32>
    %182 = arith.addf %178, %181 : vector<16x8xf32>
    %cst_133 = arith.constant 0.353553385 : f32
    %183 = vector.broadcast %cst_133 : f32 to vector<16x8xf32>
    %184 = arith.mulf %182, %183 : vector<16x8xf32>
    %c0_134 = arith.constant 0 : index
    %c3_135 = arith.constant 3 : index
    %c0_136 = arith.constant 0 : index
    %c0_137 = arith.constant 0 : index
    %185 = vector.load %arg8[%c0_134, %c3_135, %c0_136, %c0_137] : memref<1x4x32x8xf32, #tpu.memory_space<vmem>>, vector<1x1x32x8xf32>
    %186 = vector.shape_cast %185 : vector<1x1x32x8xf32> to vector<32x8xf32>
    %cst_138 = arith.constant dense<0.000000e+00> : vector<16x8xf32>
    %187 = tpu.matmul %29, %186, %cst_138 {dimension_numbers = #tpu.dot_dimension_numbers<[1], [0], [0], [1], [0, 0, 1, 1], [], []>} : vector<16x32xf32>, vector<32x8xf32>, vector<16x8xf32> -> vector<16x8xf32>
    %c0_139 = arith.constant 0 : index
    %c3_140 = arith.constant 3 : index
    %c0_141 = arith.constant 0 : index
    %c0_142 = arith.constant 0 : index
    %188 = vector.load %arg9[%c0_139, %c3_140, %c0_141, %c0_142] : memref<1x4x1x8xf32, #tpu.memory_space<vmem>>, vector<1x1x1x8xf32>
    %189 = vector.shape_cast %188 : vector<1x1x1x8xf32> to vector<1x8xf32>
    %190 = vector.broadcast %189 : vector<1x8xf32> to vector<16x8xf32>
    %191 = arith.addf %187, %190 : vector<16x8xf32>
    %c0_143 = arith.constant 0 : index
    %c3_144 = arith.constant 3 : index
    %c0_145 = arith.constant 0 : index
    %c0_146 = arith.constant 0 : index
    %192 = vector.load %arg10[%c0_143, %c3_144, %c0_145, %c0_146] : memref<1x4x32x8xf32, #tpu.memory_space<vmem>>, vector<1x1x32x8xf32>
    %193 = vector.shape_cast %192 : vector<1x1x32x8xf32> to vector<32x8xf32>
    %cst_147 = arith.constant dense<0.000000e+00> : vector<16x8xf32>
    %194 = tpu.matmul %29, %193, %cst_147 {dimension_numbers = #tpu.dot_dimension_numbers<[1], [0], [0], [1], [0, 0, 1, 1], [], []>} : vector<16x32xf32>, vector<32x8xf32>, vector<16x8xf32> -> vector<16x8xf32>
    %c0_148 = arith.constant 0 : index
    %c3_149 = arith.constant 3 : index
    %c0_150 = arith.constant 0 : index
    %c0_151 = arith.constant 0 : index
    %195 = vector.load %arg11[%c0_148, %c3_149, %c0_150, %c0_151] : memref<1x4x1x8xf32, #tpu.memory_space<vmem>>, vector<1x1x1x8xf32>
    %196 = vector.shape_cast %195 : vector<1x1x1x8xf32> to vector<1x8xf32>
    %197 = vector.broadcast %196 : vector<1x8xf32> to vector<16x8xf32>
    %198 = arith.addf %194, %197 : vector<16x8xf32>
    %199 = vector.shape_cast %184 : vector<16x8xf32> to vector<2x8x8xf32>
    %200 = vector.shape_cast %191 : vector<16x8xf32> to vector<2x8x8xf32>
    %201 = vector.shape_cast %198 : vector<16x8xf32> to vector<2x8x8xf32>
    "tpu.trace_start"() <{level = 10 : i32, message = "bqe,bke->bqk"}> : () -> ()
    %cst_152 = arith.constant dense<0.000000e+00> : vector<2x8x8xf32>
    %202 = tpu.matmul %199, %200, %cst_152 {dimension_numbers = #tpu.dot_dimension_numbers<[2], [2], [1], [1], [0, 0, 0, 1, 1, 1], [0], [0]>} : vector<2x8x8xf32>, vector<2x8x8xf32>, vector<2x8x8xf32> -> vector<2x8x8xf32>
    %cst_153 = arith.constant -1.000000e+30 : f32
    "tpu.trace_stop"() : () -> ()
    %203 = vector.shape_cast %33 : vector<1x8x8xi1> to vector<1x8x8xi1>
    %204 = vector.broadcast %203 : vector<1x8x8xi1> to vector<2x8x8xi1>
    %205 = vector.broadcast %cst_153 : f32 to vector<2x8x8xf32>
    %206 = arith.select %204, %202, %205 : vector<2x8x8xi1>, vector<2x8x8xf32>
    %cst_154 = arith.constant dense<0xFF800000> : vector<2x8xf32>
    %207 = vector.multi_reduction <maximumf>, %206, %cst_154 [2] : vector<2x8x8xf32> to vector<2x8xf32>
    %208 = vector.shape_cast %207 : vector<2x8xf32> to vector<2x8x1xf32>
    %209 = vector.broadcast %208 : vector<2x8x1xf32> to vector<2x8x8xf32>
    %210 = arith.subf %206, %209 : vector<2x8x8xf32>
    %211 = math.exp %210 : vector<2x8x8xf32>
    %cst_155 = arith.constant dense<0.000000e+00> : vector<2x8xf32>
    %212 = vector.multi_reduction <add>, %211, %cst_155 [2] : vector<2x8x8xf32> to vector<2x8xf32>
    %213 = vector.shape_cast %212 : vector<2x8xf32> to vector<2x8x1xf32>
    %214 = tpu.reciprocal %213 {approx = true} : vector<2x8x1xf32> -> vector<2x8x1xf32>
    %215 = vector.broadcast %214 : vector<2x8x1xf32> to vector<2x8x8xf32>
    %216 = arith.mulf %211, %215 : vector<2x8x8xf32>
    "tpu.trace_start"() <{level = 10 : i32, message = "bqk,bke->bqe"}> : () -> ()
    %cst_156 = arith.constant dense<0.000000e+00> : vector<2x8x8xf32>
    %217 = tpu.matmul %216, %201, %cst_156 {dimension_numbers = #tpu.dot_dimension_numbers<[2], [1], [1], [2], [0, 0, 0, 1, 1, 2], [0], [0]>} : vector<2x8x8xf32>, vector<2x8x8xf32>, vector<2x8x8xf32> -> vector<2x8x8xf32>
    "tpu.trace_stop"() : () -> ()
    %218 = vector.shape_cast %217 : vector<2x8x8xf32> to vector<16x8xf32>
    %c0_157 = arith.constant 0 : index
    %c3_158 = arith.constant 3 : index
    %c0_159 = arith.constant 0 : index
    %c0_160 = arith.constant 0 : index
    %219 = vector.load %arg12[%c0_157, %c3_158, %c0_159, %c0_160] : memref<1x4x8x32xf32, #tpu.memory_space<vmem>>, vector<1x1x8x32xf32>
    %220 = vector.shape_cast %219 : vector<1x1x8x32xf32> to vector<8x32xf32>
    %cst_161 = arith.constant dense<0.000000e+00> : vector<16x32xf32>
    %221 = tpu.matmul %218, %220, %cst_161 {dimension_numbers = #tpu.dot_dimension_numbers<[1], [0], [0], [1], [0, 0, 1, 1], [], []>} : vector<16x8xf32>, vector<8x32xf32>, vector<16x32xf32> -> vector<16x32xf32>
    %222 = arith.addf %175, %221 : vector<16x32xf32>
    %223 = arith.addf %3, %222 : vector<16x32xf32>
    %c0_162 = arith.constant 0 : index
    %c0_163 = arith.constant 0 : index
    %c0_164 = arith.constant 0 : index
    %224 = vector.load %arg13[%c0_162, %c0_163, %c0_164] : memref<1x1x32xf32, #tpu.memory_space<vmem>>, vector<1x1x32xf32>
    %225 = vector.shape_cast %224 : vector<1x1x32xf32> to vector<1x32xf32>
    %226 = vector.broadcast %225 : vector<1x32xf32> to vector<16x32xf32>
    %227 = arith.addf %223, %226 : vector<16x32xf32>
    %c0_165 = arith.constant 0 : index
    %c0_166 = arith.constant 0 : index
    %c0_167 = arith.constant 0 : index
    %228 = vector.load %arg14[%c0_165, %c0_166, %c0_167] : memref<1x1x32xf32, #tpu.memory_space<vmem>>, vector<1x1x32xf32>
    %229 = vector.shape_cast %228 : vector<1x1x32xf32> to vector<1x32xf32>
    %c0_168 = arith.constant 0 : index
    %c0_169 = arith.constant 0 : index
    %c0_170 = arith.constant 0 : index
    %230 = vector.load %arg15[%c0_168, %c0_169, %c0_170] : memref<1x1x32xf32, #tpu.memory_space<vmem>>, vector<1x1x32xf32>
    %231 = vector.shape_cast %230 : vector<1x1x32xf32> to vector<1x32xf32>
    %cst_171 = arith.constant dense<0.000000e+00> : vector<16xf32>
    %232 = vector.multi_reduction <add>, %227, %cst_171 [1] : vector<16x32xf32> to vector<16xf32>
    %233 = vector.shape_cast %232 : vector<16xf32> to vector<16x1xf32>
    %cst_172 = arith.constant 3.200000e+01 : f32
    %234 = vector.broadcast %cst_172 : f32 to vector<16x1xf32>
    %235 = arith.divf %233, %234 : vector<16x1xf32>
    %236 = vector.broadcast %235 : vector<16x1xf32> to vector<16x32xf32>
    %237 = arith.subf %227, %236 : vector<16x32xf32>
    %238 = arith.mulf %237, %237 : vector<16x32xf32>
    %cst_173 = arith.constant dense<0.000000e+00> : vector<16xf32>
    %239 = vector.multi_reduction <add>, %238, %cst_173 [1] : vector<16x32xf32> to vector<16xf32>
    %240 = vector.shape_cast %239 : vector<16xf32> to vector<16x1xf32>
    %cst_174 = arith.constant 3.200000e+01 : f32
    %241 = vector.broadcast %cst_174 : f32 to vector<16x1xf32>
    %242 = arith.divf %240, %241 : vector<16x1xf32>
    %243 = vector.broadcast %235 : vector<16x1xf32> to vector<16x32xf32>
    %244 = arith.subf %227, %243 : vector<16x32xf32>
    %cst_175 = arith.constant 9.99999974E-6 : f32
    %245 = vector.broadcast %cst_175 : f32 to vector<16x1xf32>
    %246 = arith.addf %242, %245 : vector<16x1xf32>
    %247 = math.rsqrt %246 : vector<16x1xf32>
    %248 = vector.broadcast %247 : vector<16x1xf32> to vector<16x32xf32>
    %249 = arith.mulf %244, %248 : vector<16x32xf32>
    %250 = vector.broadcast %229 : vector<1x32xf32> to vector<16x32xf32>
    %251 = arith.mulf %249, %250 : vector<16x32xf32>
    %252 = vector.broadcast %231 : vector<1x32xf32> to vector<16x32xf32>
    %253 = arith.addf %251, %252 : vector<16x32xf32>
    %c0_176 = arith.constant 0 : index
    %c0_177 = arith.constant 0 : index
    %c0_178 = arith.constant 0 : index
    %254 = vector.load %arg16[%c0_176, %c0_177, %c0_178] : memref<1x32x128xf32, #tpu.memory_space<vmem>>, vector<1x32x128xf32>
    %255 = vector.shape_cast %254 : vector<1x32x128xf32> to vector<32x128xf32>
    %cst_179 = arith.constant dense<0.000000e+00> : vector<16x128xf32>
    %256 = tpu.matmul %253, %255, %cst_179 {dimension_numbers = #tpu.dot_dimension_numbers<[1], [0], [0], [1], [0, 0, 1, 1], [], []>} : vector<16x32xf32>, vector<32x128xf32>, vector<16x128xf32> -> vector<16x128xf32>
    %c0_180 = arith.constant 0 : index
    %c0_181 = arith.constant 0 : index
    %c0_182 = arith.constant 0 : index
    %257 = vector.load %arg17[%c0_180, %c0_181, %c0_182] : memref<1x1x128xf32, #tpu.memory_space<vmem>>, vector<1x1x128xf32>
    %258 = vector.shape_cast %257 : vector<1x1x128xf32> to vector<1x128xf32>
    %259 = vector.broadcast %258 : vector<1x128xf32> to vector<16x128xf32>
    %260 = arith.addf %256, %259 : vector<16x128xf32>
    %cst_183 = arith.constant 1.702000e+00 : f32
    %261 = vector.broadcast %cst_183 : f32 to vector<16x128xf32>
    %262 = arith.mulf %261, %260 : vector<16x128xf32>
    %263 = arith.negf %262 : vector<16x128xf32>
    %264 = math.exp %263 : vector<16x128xf32>
    %cst_184 = arith.constant 1.000000e+00 : f32
    %265 = vector.broadcast %cst_184 : f32 to vector<16x128xf32>
    %266 = arith.addf %265, %264 : vector<16x128xf32>
    %267 = arith.divf %265, %266 : vector<16x128xf32>
    %268 = arith.mulf %260, %267 : vector<16x128xf32>
    %c0_185 = arith.constant 0 : index
    %c0_186 = arith.constant 0 : index
    %c0_187 = arith.constant 0 : index
    %269 = vector.load %arg18[%c0_185, %c0_186, %c0_187] : memref<1x128x32xf32, #tpu.memory_space<vmem>>, vector<1x128x32xf32>
    %270 = vector.shape_cast %269 : vector<1x128x32xf32> to vector<128x32xf32>
    %cst_188 = arith.constant dense<0.000000e+00> : vector<16x32xf32>
    %271 = tpu.matmul %268, %270, %cst_188 {dimension_numbers = #tpu.dot_dimension_numbers<[1], [0], [0], [1], [0, 0, 1, 1], [], []>} : vector<16x128xf32>, vector<128x32xf32>, vector<16x32xf32> -> vector<16x32xf32>
    %272 = arith.addf %227, %271 : vector<16x32xf32>
    %c0_189 = arith.constant 0 : index
    %c0_190 = arith.constant 0 : index
    %c0_191 = arith.constant 0 : index
    %273 = vector.load %arg19[%c0_189, %c0_190, %c0_191] : memref<1x1x32xf32, #tpu.memory_space<vmem>>, vector<1x1x32xf32>
    %274 = vector.shape_cast %273 : vector<1x1x32xf32> to vector<1x32xf32>
    %275 = vector.broadcast %274 : vector<1x32xf32> to vector<16x32xf32>
    %276 = arith.addf %272, %275 : vector<16x32xf32>
    %c0_192 = arith.constant 0 : index
    %c0_193 = arith.constant 0 : index
    %277 = vector.load %arg24[%c0_192, %c0_193] : memref<16x32xf32, #tpu.memory_space<vmem>>, vector<16x32xf32>
    tpu.vector_store %arg24[%c0_192, %c0_193], %276 {strides = array<i32>} : memref<16x32xf32, #tpu.memory_space<vmem>>, vector<16x32xf32>,
    %c1_i32 = arith.constant 1 : i32
    %278 = arith.cmpi eq, %arg0, %c1_i32 : i32
    %279 = arith.extui %278 : i1 to i32
    %c0_i32_194 = arith.constant 0 : i32
    %280 = arith.cmpi ne, %279, %c0_i32_194 : i32
    scf.if %280 {
      %281 = tpu.iota {dimensions = array<i32: 0>} : vector<8x1xi32>
      %c0_195 = arith.constant 0 : index
      %282 = memref.load %arg1[%c0_195] : memref<2xi32, #tpu.memory_space<smem>>
      %283 = vector.broadcast %282 : i32 to vector<8x1xi32>
      %284 = arith.cmpi eq, %281, %283 : vector<8x1xi32>
      %285 = arith.extui %284 : vector<8x1xi1> to vector<8x1xi32>
      %286 = arith.sitofp %285 : vector<8x1xi32> to vector<8x1xf32>
      %287 = vector.extract_strided_slice %276 {offsets = [0, 0], sizes = [8, 32], strides = [1, 1]} : vector<16x32xf32> to vector<8x32xf32>
      %288 = vector.broadcast %286 : vector<8x1xf32> to vector<8x32xf32>
      %289 = arith.mulf %287, %288 : vector<8x32xf32>
      %cst_196 = arith.constant dense<0.000000e+00> : vector<32xf32>
      %290 = vector.multi_reduction <add>, %289, %cst_196 [0] : vector<8x32xf32> to vector<32xf32>
      %291 = vector.shape_cast %290 : vector<32xf32> to vector<1x32xf32>
      %c1_197 = arith.constant 1 : index
      %292 = memref.load %arg1[%c1_197] : memref<2xi32, #tpu.memory_space<smem>>
      %293 = vector.broadcast %292 : i32 to vector<8x1xi32>
      %294 = arith.cmpi eq, %281, %293 : vector<8x1xi32>
      %295 = arith.extui %294 : vector<8x1xi1> to vector<8x1xi32>
      %296 = arith.sitofp %295 : vector<8x1xi32> to vector<8x1xf32>
      %297 = vector.extract_strided_slice %276 {offsets = [8, 0], sizes = [8, 32], strides = [1, 1]} : vector<16x32xf32> to vector<8x32xf32>
      %298 = vector.broadcast %296 : vector<8x1xf32> to vector<8x32xf32>
      %299 = arith.mulf %297, %298 : vector<8x32xf32>
      %cst_198 = arith.constant dense<0.000000e+00> : vector<32xf32>
      %300 = vector.multi_reduction <add>, %299, %cst_198 [0] : vector<8x32xf32> to vector<32xf32>
      %301 = vector.shape_cast %300 : vector<32xf32> to vector<1x32xf32>
      %302 = tpu.concatenate %291, %301 in 0 : vector<1x32xf32>, vector<1x32xf32> -> vector<2x32xf32>
      %c0_199 = arith.constant 0 : index
      %c0_200 = arith.constant 0 : index
      %303 = vector.load %arg20[%c0_199, %c0_200] : memref<1x32xf32, #tpu.memory_space<vmem>>, vector<1x32xf32>
      %c0_201 = arith.constant 0 : index
      %c0_202 = arith.constant 0 : index
      %304 = vector.load %arg21[%c0_201, %c0_202] : memref<1x32xf32, #tpu.memory_space<vmem>>, vector<1x32xf32>
      %cst_203 = arith.constant dense<0.000000e+00> : vector<2xf32>
      %305 = vector.multi_reduction <add>, %302, %cst_203 [1] : vector<2x32xf32> to vector<2xf32>
      %306 = vector.shape_cast %305 : vector<2xf32> to vector<2x1xf32>
      %cst_204 = arith.constant 3.200000e+01 : f32
      %307 = vector.broadcast %cst_204 : f32 to vector<2x1xf32>
      %308 = arith.divf %306, %307 : vector<2x1xf32>
      %309 = vector.broadcast %308 : vector<2x1xf32> to vector<2x32xf32>
      %310 = arith.subf %302, %309 : vector<2x32xf32>
      %311 = arith.mulf %310, %310 : vector<2x32xf32>
      %cst_205 = arith.constant dense<0.000000e+00> : vector<2xf32>
      %312 = vector.multi_reduction <add>, %311, %cst_205 [1] : vector<2x32xf32> to vector<2xf32>
      %313 = vector.shape_cast %312 : vector<2xf32> to vector<2x1xf32>
      %cst_206 = arith.constant 3.200000e+01 : f32
      %314 = vector.broadcast %cst_206 : f32 to vector<2x1xf32>
      %315 = arith.divf %313, %314 : vector<2x1xf32>
      %316 = vector.broadcast %308 : vector<2x1xf32> to vector<2x32xf32>
      %317 = arith.subf %302, %316 : vector<2x32xf32>
      %cst_207 = arith.constant 9.99999974E-6 : f32
      %318 = vector.broadcast %cst_207 : f32 to vector<2x1xf32>
      %319 = arith.addf %315, %318 : vector<2x1xf32>
      %320 = math.rsqrt %319 : vector<2x1xf32>
      %321 = vector.broadcast %320 : vector<2x1xf32> to vector<2x32xf32>
      %322 = arith.mulf %317, %321 : vector<2x32xf32>
      %323 = vector.broadcast %303 : vector<1x32xf32> to vector<2x32xf32>
      %324 = arith.mulf %322, %323 : vector<2x32xf32>
      %325 = vector.broadcast %304 : vector<1x32xf32> to vector<2x32xf32>
      %326 = arith.addf %324, %325 : vector<2x32xf32>
      %c0_208 = arith.constant 0 : index
      %c0_209 = arith.constant 0 : index
      %327 = vector.load %arg22[%c0_208, %c0_209] : memref<32x16xf32, #tpu.memory_space<vmem>>, vector<32x16xf32>
      %cst_210 = arith.constant dense<0.000000e+00> : vector<2x16xf32>
      %328 = tpu.matmul %326, %327, %cst_210 {dimension_numbers = #tpu.dot_dimension_numbers<[1], [0], [0], [1], [0, 0, 1, 1], [], []>} : vector<2x32xf32>, vector<32x16xf32>, vector<2x16xf32> -> vector<2x16xf32>
      %c0_211 = arith.constant 0 : index
      %c0_212 = arith.constant 0 : index
      %329 = vector.load %arg23[%c0_211, %c0_212] : memref<2x16xf32, #tpu.memory_space<vmem>>, vector<2x16xf32>
      tpu.vector_store %arg23[%c0_211, %c0_212], %328 {strides = array<i32>} : memref<2x16xf32, #tpu.memory_space<vmem>>, vector<2x16xf32>,
    } else {
    }
    return
  }
  func.func @transform_0(%arg0: i32, %arg1: memref<2xi32, #tpu.memory_space<smem>>) -> (i32, i32) {
    %c0_i32 = arith.constant 0 : i32
    %c0_i32_0 = arith.constant 0 : i32
    %c0_i32_1 = arith.constant 0 : i32
    return %c0_i32, %c0_i32_0 : i32, i32
  }
  func.func @transform_1(%arg0: i32, %arg1: memref<2xi32, #tpu.memory_space<smem>>) -> (i32, i32) {
    %c0_i32 = arith.constant 0 : i32
    %c0_i32_0 = arith.constant 0 : i32
    %c0_i32_1 = arith.constant 0 : i32
    return %c0_i32, %c0_i32_0 : i32, i32
  }
  func.func @transform_2(%arg0: i32, %arg1: memref<2xi32, #tpu.memory_space<smem>>) -> (i32, i32, i32) {
    %c0_i32 = arith.constant 0 : i32
    %c0_i32_0 = arith.constant 0 : i32
    %c0_i32_1 = arith.constant 0 : i32
    return %arg0, %c0_i32, %c0_i32_0 : i32, i32, i32
  }
  func.func @transform_3(%arg0: i32, %arg1: memref<2xi32, #tpu.memory_space<smem>>) -> (i32, i32, i32) {
    %c0_i32 = arith.constant 0 : i32
    %c0_i32_0 = arith.constant 0 : i32
    %c0_i32_1 = arith.constant 0 : i32
    return %arg0, %c0_i32, %c0_i32_0 : i32, i32, i32
  }
  func.func @transform_4(%arg0: i32, %arg1: memref<2xi32, #tpu.memory_space<smem>>) -> (i32, i32, i32, i32) {
    %c0_i32 = arith.constant 0 : i32
    %c0_i32_0 = arith.constant 0 : i32
    %c0_i32_1 = arith.constant 0 : i32
    %c0_i32_2 = arith.constant 0 : i32
    return %arg0, %c0_i32, %c0_i32_0, %c0_i32_1 : i32, i32, i32, i32
  }
  func.func @transform_5(%arg0: i32, %arg1: memref<2xi32, #tpu.memory_space<smem>>) -> (i32, i32, i32, i32) {
    %c0_i32 = arith.constant 0 : i32
    %c0_i32_0 = arith.constant 0 : i32
    %c0_i32_1 = arith.constant 0 : i32
    %c0_i32_2 = arith.constant 0 : i32
    return %arg0, %c0_i32, %c0_i32_0, %c0_i32_1 : i32, i32, i32, i32
  }
  func.func @transform_6(%arg0: i32, %arg1: memref<2xi32, #tpu.memory_space<smem>>) -> (i32, i32, i32, i32) {
    %c0_i32 = arith.constant 0 : i32
    %c0_i32_0 = arith.constant 0 : i32
    %c0_i32_1 = arith.constant 0 : i32
    %c0_i32_2 = arith.constant 0 : i32
    return %arg0, %c0_i32, %c0_i32_0, %c0_i32_1 : i32, i32, i32, i32
  }
  func.func @transform_7(%arg0: i32, %arg1: memref<2xi32, #tpu.memory_space<smem>>) -> (i32, i32, i32, i32) {
    %c0_i32 = arith.constant 0 : i32
    %c0_i32_0 = arith.constant 0 : i32
    %c0_i32_1 = arith.constant 0 : i32
    %c0_i32_2 = arith.constant 0 : i32
    return %arg0, %c0_i32, %c0_i32_0, %c0_i32_1 : i32, i32, i32, i32
  }
  func.func @transform_8(%arg0: i32, %arg1: memref<2xi32, #tpu.memory_space<smem>>) -> (i32, i32, i32, i32) {
    %c0_i32 = arith.constant 0 : i32
    %c0_i32_0 = arith.constant 0 : i32
    %c0_i32_1 = arith.constant 0 : i32
    %c0_i32_2 = arith.constant 0 : i32
    return %arg0, %c0_i32, %c0_i32_0, %c0_i32_1 : i32, i32, i32, i32
  }
  func.func @transform_9(%arg0: i32, %arg1: memref<2xi32, #tpu.memory_space<smem>>) -> (i32, i32, i32, i32) {
    %c0_i32 = arith.constant 0 : i32
    %c0_i32_0 = arith.constant 0 : i32
    %c0_i32_1 = arith.constant 0 : i32
    %c0_i32_2 = arith.constant 0 : i32
    return %arg0, %c0_i32, %c0_i32_0, %c0_i32_1 : i32, i32, i32, i32
  }
  func.func @transform_10(%arg0: i32, %arg1: memref<2xi32, #tpu.memory_space<smem>>) -> (i32, i32, i32, i32) {
    %c0_i32 = arith.constant 0 : i32
    %c0_i32_0 = arith.constant 0 : i32
    %c0_i32_1 = arith.constant 0 : i32
    %c0_i32_2 = arith.constant 0 : i32
    return %arg0, %c0_i32, %c0_i32_0, %c0_i32_1 : i32, i32, i32, i32
  }
  func.func @transform_11(%arg0: i32, %arg1: memref<2xi32, #tpu.memory_space<smem>>) -> (i32, i32, i32) {
    %c0_i32 = arith.constant 0 : i32
    %c0_i32_0 = arith.constant 0 : i32
    %c0_i32_1 = arith.constant 0 : i32
    return %arg0, %c0_i32, %c0_i32_0 : i32, i32, i32
  }
  func.func @transform_12(%arg0: i32, %arg1: memref<2xi32, #tpu.memory_space<smem>>) -> (i32, i32, i32) {
    %c0_i32 = arith.constant 0 : i32
    %c0_i32_0 = arith.constant 0 : i32
    %c0_i32_1 = arith.constant 0 : i32
    return %arg0, %c0_i32, %c0_i32_0 : i32, i32, i32
  }
  func.func @transform_13(%arg0: i32, %arg1: memref<2xi32, #tpu.memory_space<smem>>) -> (i32, i32, i32) {
    %c0_i32 = arith.constant 0 : i32
    %c0_i32_0 = arith.constant 0 : i32
    %c0_i32_1 = arith.constant 0 : i32
    return %arg0, %c0_i32, %c0_i32_0 : i32, i32, i32
  }
  func.func @transform_14(%arg0: i32, %arg1: memref<2xi32, #tpu.memory_space<smem>>) -> (i32, i32, i32) {
    %c0_i32 = arith.constant 0 : i32
    %c0_i32_0 = arith.constant 0 : i32
    %c0_i32_1 = arith.constant 0 : i32
    return %arg0, %c0_i32, %c0_i32_0 : i32, i32, i32
  }
  func.func @transform_15(%arg0: i32, %arg1: memref<2xi32, #tpu.memory_space<smem>>) -> (i32, i32, i32) {
    %c0_i32 = arith.constant 0 : i32
    %c0_i32_0 = arith.constant 0 : i32
    %c0_i32_1 = arith.constant 0 : i32
    return %arg0, %c0_i32, %c0_i32_0 : i32, i32, i32
  }
  func.func @transform_16(%arg0: i32, %arg1: memref<2xi32, #tpu.memory_space<smem>>) -> (i32, i32, i32) {
    %c0_i32 = arith.constant 0 : i32
    %c0_i32_0 = arith.constant 0 : i32
    %c0_i32_1 = arith.constant 0 : i32
    return %arg0, %c0_i32, %c0_i32_0 : i32, i32, i32
  }
  func.func @transform_17(%arg0: i32, %arg1: memref<2xi32, #tpu.memory_space<smem>>) -> (i32, i32, i32) {
    %c0_i32 = arith.constant 0 : i32
    %c0_i32_0 = arith.constant 0 : i32
    %c0_i32_1 = arith.constant 0 : i32
    return %arg0, %c0_i32, %c0_i32_0 : i32, i32, i32
  }
  func.func @transform_18(%arg0: i32, %arg1: memref<2xi32, #tpu.memory_space<smem>>) -> (i32, i32) {
    %c0_i32 = arith.constant 0 : i32
    %c0_i32_0 = arith.constant 0 : i32
    %c0_i32_1 = arith.constant 0 : i32
    return %c0_i32, %c0_i32_0 : i32, i32
  }
  func.func @transform_19(%arg0: i32, %arg1: memref<2xi32, #tpu.memory_space<smem>>) -> (i32, i32) {
    %c0_i32 = arith.constant 0 : i32
    %c0_i32_0 = arith.constant 0 : i32
    %c0_i32_1 = arith.constant 0 : i32
    return %c0_i32, %c0_i32_0 : i32, i32
  }
  func.func @transform_20(%arg0: i32, %arg1: memref<2xi32, #tpu.memory_space<smem>>) -> (i32, i32) {
    %c0_i32 = arith.constant 0 : i32
    %c0_i32_0 = arith.constant 0 : i32
    %c0_i32_1 = arith.constant 0 : i32
    return %c0_i32, %c0_i32_0 : i32, i32
  }
  func.func @transform_21(%arg0: i32, %arg1: memref<2xi32, #tpu.memory_space<smem>>) -> (i32, i32) {
    %c0_i32 = arith.constant 0 : i32
    %c0_i32_0 = arith.constant 0 : i32
    %c0_i32_1 = arith.constant 0 : i32
    return %c0_i32, %c0_i32_0 : i32, i32
  }
}

</mosaic_0001>

<bundles_post_ra>
// kernel: text_encoder.1
= control target key start
LH: loop header
LB: loop body
LE: loop exit
PB: predicated region body
PF: predicated region fallthrough
CT: control target
= control target key end

     0   :  { %s2787_s30 = smov [#allocation4]   ;;  %s3345_s0 = inlined_call_operand.vmem [shape: s32[2], index: 0, kind: input, shape index: {}]   ;;  %s3346_s1 = inlined_call_operand.vmem [shape: f32[16,32], index: 1, kind: input, shape index: {}]   ;;  %s3347_s2 = inlined_call_operand.vmem [shape: f32[8,32], index: 2, kind: input, shape index: {}]   ;;  %s3348_s3 = inlined_call_operand.vmem [shape: f32[2,1,32], index: 3, kind: input, shape index: {}]   ;;  %s3349_s4 = inlined_call_operand.vmem [shape: f32[2,1,32], index: 4, kind: input, shape index: {}]   ;;  %s3350_s5 = inlined_call_operand.vmem [shape: f32[2,4,32,8], index: 5, kind: input, shape index: {}]   ;;  %s3351_s6 = inlined_call_operand.vmem [shape: f32[2,4,1,8], index: 6, kind: input, shape index: {}]   ;;  %s3352_s7 = inlined_call_operand.vmem [shape: f32[2,4,32,8], index: 7, kind: input, shape index: {}]   ;;  %s3353_s8 = inlined_call_operand.vmem [shape: f32[2,4,1,8], index: 8, kind: input, shape index: {}]   ;;  %s3354_s9 = inlined_call_operand.vmem [shape: f32[2,4,32,8], index: 9, kind: input, shape index: {}]   ;;  %s3355_s10 = inlined_call_operand.vmem [shape: f32[2,4,1,8], index: 10, kind: input, shape index: {}]   ;;  %s3356_s11 = inlined_call_operand.vmem [shape: f32[2,4,8,32], index: 11, kind: input, shape index: {}]   ;;  %s3357_s12 = inlined_call_operand.vmem [shape: f32[2,1,32], index: 12, kind: input, shape index: {}]   ;;  %s3358_s13 = inlined_call_operand.vmem [shape: f32[2,1,32], index: 13, kind: input, shape index: {}]   ;;  %s3359_s14 = inlined_call_operand.vmem [shape: f32[2,1,32], index: 14, kind: input, shape index: {}]   ;;  %s3360_s15 = inlined_call_operand.vmem [shape: f32[2,32,128], index: 15, kind: input, shape index: {}]   ;;  %s3361_s16 = inlined_call_operand.vmem [shape: f32[2,1,128], index: 16, kind: input, shape index: {}]   ;;  %s3362_s17 = inlined_call_operand.vmem [shape: f32[2,128,32], index: 17, kind: input, shape index: {}]   ;;  %s3363_s18 = inlined_call_operand.vmem [shape: f32[2,1,32], index: 18, kind: input, shape index: {}]   ;;  %s3364_s19 = inlined_call_operand.vmem [shape: f32[1,32], index: 19, kind: input, shape index: {}]   ;;  %s3365_s20 = inlined_call_operand.vmem [shape: f32[1,32], index: 20, kind: input, shape index: {}]   ;;  %s3366_s21 = inlined_call_operand.vmem [shape: f32[32,16], index: 21, kind: input, shape index: {}]   ;;  %s3367_s22 = inlined_call_operand.hbm [shape: f32[2,16], index: 22, kind: output, shape index: {}]  }
   0x1   :  { %3372 = sst [smem:[#allocation11_spill]] %s3345_s0 }
   0x2   :  { %3373 = sst [smem:[#allocation12_spill]] %s3346_s1 }
   0x3   :  { %3374 = sst [smem:[#allocation13_spill]] %s3347_s2 }
   0x4   :  { %3375 = sst [smem:[#allocation14_spill]] %s3348_s3 }
   0x5   :  { %3376 = sst [smem:[#allocation15_spill]] %s3349_s4 }
   0x6   :  { %3377 = sst [smem:[#allocation16_spill]] %s3350_s5 }
   0x7   :  { %3378 = sst [smem:[#allocation17_spill]] %s3351_s6 }
   0x8   :  { %3379 = sst [smem:[#allocation18_spill]] %s3352_s7 }
   0x9   :  { %3380 = sst [smem:[#allocation19_spill]] %s3353_s8 }
   0xa   :  { %3381 = sst [smem:[#allocation20_spill]] %s3354_s9 }
   0xb   :  { %3382 = sst [smem:[#allocation21_spill]] %s3355_s10 }
   0xc   :  { %3383 = sst [smem:[#allocation22_spill]] %s3356_s11 }
   0xd   :  { %3384 = sst [smem:[#allocation23_spill]] %s3357_s12 }
   0xe   :  { %3385 = sst [smem:[#allocation24_spill]] %s3361_s16 }
   0xf   :  { %3386 = sst [smem:[#allocation25_spill]] %s3364_s19 }
  0x10   :  { %3387 = sst [smem:[#allocation26_spill]] %s3365_s20 }
  0x11   :  { %3388 = sst [smem:[#allocation27_spill]] %s3366_s21 }
  0x12   :  { %3389 = sst [smem:[#allocation28_spill]] %s3367_s22 }
  0x13   :  { %s3390_s29 = sld [smem:[#allocation11_spill]] }
  0x19   :  { %s28_s16 = sshll.u32 %s3390_s29, 4  ;;  %s29_s16 = int_to_ptr.vmem [resolvable:$true] %s28_s16 }
  0x1a   :  { %31 = dma.vmem_to_smem %s29_s16, 16, %s2787_s30, [#allocation3] }
  0x1b   :  { %2777 = dma.done.wait [#allocation3], 16 }
  0x1c   :  { %2778 = vsyncadd [#allocation3], 4294967280 }
  0x1d   :  { %34 = sfence }
  0x1e   :  { %35 = vsyncpa [#allocation6], 0  ;;  %s2909_s4 = smov 0  }
  0x1f LB: > { %3391 = sst [smem:[#allocation9_spill]] %s2785_s4  ;;  %s2915_s0 = sadd.s32 4294967295, %s2785_s4   ;;  %s2785_s4 = sphi %s2909_s4, %s41_s4  }
  0x20   : > { %p2502_p0 = scmp.ge.s32.totalorder %s2785_s4, 1  ;;  %p725_p1 = scmp.lt.s32.totalorder %s2785_s4, 3 }
  0x22   : > { %p726_p2 = pnand %p2502_p0, %p725_p1 }
  0x24   : > { %729 = sbr.rel (%p726_p2) target bundleno = 3604 (0xe14), region = 104 }
  0x29   : > { %p838_p3 = scmp.lt.s32.totalorder %s2915_s0, 1  ;;  %s3394_s30 = sld [smem:[#allocation16_spill]] }
  0x2a   : > { %s3395_s22 = sld [smem:[#allocation17_spill]]  ;;  %p2518_p4 = scmp.ne.s32.totalorder %s2915_s0, 0 }
  0x2b   : > { %s2921_s16 = scalar_select %p838_p3, %s2915_s0, 1 }
  0x2c   : > { %s3397_s7 = sld [smem:[#allocation18_spill]] }
  0x2d   : > { %s2636_s27 = sshll.u32 %s2921_s16, 7  ;;  %s2505_s3 = sshll.u32 %s2921_s16, 2 }
  0x2e   : > { %s3398_s8 = sld [smem:[#allocation19_spill]]  ;;  %s2639_s4 = sshll.u32 %s2921_s16, 5 }
  0x2f   : > { %s2936_s23 = scalar_lea.vmem %s3394_s30, %s2636_s27  ;;  %s3399_s9 = sld [smem:[#allocation20_spill]] }
  0x30   : > { %s2941_s20 = scalar_lea.vmem %s3395_s22, %s2505_s3  ;;  %s3400_s10 = sld [smem:[#allocation21_spill]] }
  0x31   : > { %3396 = sst [smem:[#allocation10_spill]] %s2941_s20  ;;  %s900_s21 = scalar_lea.vmem %s3363_s18, %s2921_s16 }
  0x32   : > { %s2946_s24 = scalar_lea.vmem %s3397_s7, %s2636_s27  ;;  %s3402_s11 = sld [smem:[#allocation22_spill]] }
  0x33   : > { %s3403_s5 = sld [smem:[#allocation24_spill]] }
  0x34   : > { %s2951_s26 = scalar_lea.vmem %s3398_s8, %s2505_s3  ;;  %s3406_s1 = sld [smem:[#allocation13_spill]] (!%p2518_p4) }
  0x35   : > { %s2956_s28 = scalar_lea.vmem %s3399_s9, %s2636_s27  ;;  %904 = sbr.rel (%p2518_p4) target bundleno = 68 (0x44), region = 108 }
  0x36   : > { %s2961_s22 = scalar_lea.vmem %s3400_s10, %s2505_s3  ;;  %s2984_s10 = scalar_lea.vmem %s3360_s15, %s2639_s4 }
  0x38   : > { %s2971_s6 = scalar_lea.vmem %s3402_s11, %s2639_s4  ;;  %s2993_s11 = scalar_lea.vmem %s3362_s17, %s2636_s27 }
  0x39   : > { %s892_s12 = scalar_lea.vmem %s3403_s5, %s2921_s16  ;;  %s3404_s4 = sld [smem:[#allocation12_spill]] (!%p2518_p4) }
  0x3a   : > { %v907_v1 = vld [vmem:[%s3406_s1] sm:$0xff]  ;;  %vm910_vm0 = vcmask 261120  }
  0x3f   : > { %s3405_s3 = smov %s3404_s4  ;;  %v905_v0 = vld [vmem:[%s3404_s4] sm:$0xff] }
  0x40   : > { %v906_v2 = vld [vmem:[%s3405_s3 + $0x8] sm:$0xff]  ;;  %v908_v3 = vadd.f32 %v907_v1, %v905_v0 }
  0x41   : > { %v909_v4 = vadd.f32 %v907_v1, %v906_v2 }
  0x42   : > { %911 = vst.msk [vmem:[#allocation2] sm:$0xff] %vm910_vm0, %v908_v3 }
  0x43   : > { %912 = vst.msk [vmem:[#allocation2 + $0x8] sm:$0xff] %vm910_vm0, %v909_v4 }
  0x44 PF: > { %vm917_vm1 = vcmask 261120   ;;  %v2788_v9 = vmov 32.0   ;;  %v987_v26 = vld [vmem:[%s2936_s23 + $0x18] sm:$0xff]  ;;  %v986_v29 = vld [vmem:[%s2936_s23 + $0x10] sm:$0xff]  ;;  %v985_v32 = vld [vmem:[%s2936_s23 + $0x8] sm:$0xff]  ;;  %s3407_s7 = sld [smem:[#allocation14_spill]]  ;;  %s3417_s5 = scalar_lea.vmem %s3359_s14, %s2921_s16 }
  0x45   : > { %2679 = vrcp.f32 %v2788_v9  ;;  %v1026_v27 = vld [vmem:[%s2946_s24 + $0x18] sm:$0xff]  ;;  %1010 = vmatpush.msra.mxu0 %v987_v26  ;;  %v1025_v30 = vld [vmem:[%s2946_s24 + $0x10] sm:$0xff]  ;;  %v1024_v33 = vld [vmem:[%s2946_s24 + $0x8] sm:$0xff]  ;;  %s3409_s9 = sld [smem:[#allocation15_spill]]  ;;  %vm1085_vm9 = vcmask 64512   ;;  %p2627_p5 = scmp.ne.s32.totalorder %s2915_s0, 1 }
  0x46   : > { %v1057_v28 = vld [vmem:[%s2956_s28 + $0x18] sm:$0xff]  ;;  %1043 = vmatpush.msra.mxu1 %v1026_v27  ;;  %v1056_v31 = vld [vmem:[%s2956_s28 + $0x10] sm:$0xff]  ;;  %v1055_v34 = vld [vmem:[%s2956_s28 + $0x8] sm:$0xff]  ;;  %s3411_s4 = sld [smem:[#allocation10_spill]] }
  0x47   : > { %1074 = vmatpush.msra.mxu2 %v1057_v28  ;;  %1011 = vmatpush.msra.mxu0 %v986_v29  ;;  %v984_v35 = vld [vmem:[%s2936_s23] sm:$0xff]  ;;  %v2541_v41 = vld [vmem:[%s2946_s24 + $0x38] sm:$0xff]  ;;  %v2540_v42 = vld [vmem:[%s2946_s24 + $0x30] sm:$0xff]  ;;  %s3419_s8 = sld [smem:[#allocation27_spill]] (!%p2627_p5) }
  0x48   : > { %1044 = vmatpush.msra.mxu1 %v1025_v30  ;;  %v1023_v36 = vld [vmem:[%s2946_s24] sm:$0xff]  ;;  %v2539_v44 = vld [vmem:[%s2946_s24 + $0x28] sm:$0xff]  ;;  %v979_v30 = vlaneseq  ;;  %s3421_s30 = sld [smem:[#allocation26_spill]] (!%p2627_p5) }
  0x49   : > { %v3009_v5 = vld [vmem:[#allocation2] sm:$0xff]  ;;  %1075 = vmatpush.msra.mxu2 %v1056_v31  ;;  %1012 = vmatpush.msra.mxu0 %v985_v32 }
  0x4a   : > { %v918_v6 = vsel %vm917_vm1, %v3009_v5, 0.0  ;;  %v3013_v7 = vld [vmem:[#allocation2 + $0x8] sm:$0xff]  ;;  %1045 = vmatpush.msra.mxu1 %v1024_v33  ;;  %v1054_v37 = vld [vmem:[%s2956_s28] sm:$0xff]  ;;  %s3408_s20 = scalar_lea.vmem %s3407_s7, %s2921_s16  ;;  %v3098_v31 = vshrl.u32 %v979_v30, 7  ;;  %v982_v32 = vand.u32 127, %v979_v30  ;;  %s2202_s7 = sld [smem:[#allocation4]] (!%p2627_p5) }
  0x4b   : > { %919 = vadd.xlane.f32.xlu0 %v918_v6  ;;  %v921_v8 = vsel %vm917_vm1, %v3013_v7, 0.0  ;;  %v2680_v10 = vpop.eup %2679  ;;  %1076 = vmatpush.msra.mxu2 %v1055_v34  ;;  %v2538_v46 = vld [vmem:[%s2946_s24 + $0x20] sm:$0xff]  ;;  %s3410_s2 = scalar_lea.vmem %s3409_s9, %s2921_s16 }
  0x4c   : > { %v925_v11 = vmul.f32 32.0, %v2680_v10  ;;  %vm929_vm2 = vweird.f32 %v2680_v10  ;;  %1013 = vmatpush.msra.mxu0 %v984_v35  ;;  %1046 = vmatpush.msra.mxu1 %v1023_v36  ;;  %v2660_v56 = vld [vmem:[%s3408_s20] ss:$0 sm:$0xff]  ;;  %vm3101_vm10 = vcmp.le.s32.totalorder %v982_v32, %v3098_v31  ;;  %s2629_s20 = sld [smem:[#allocation4 + $0x1]] (!%p2627_p5) }
  0x4d   : > { %1077 = vmatpush.msra.mxu2 %v1054_v37  ;;  %v2661_v59 = vld [vmem:[%s3410_s2] ss:$0 sm:$0xff] }
  0x4e   : > { %v926_v12 = vsub.f32 1.0, %v925_v11  ;;  %v2663_v9 = vld [vmem:[%s2951_s26] ss:$0 sm:$0xff] }
  0x4f   : > { %1268 = vmatpush.msrb.mxu2 %v2541_v41 }
  0x50   : > { %v927_v13 = vmul.f32 %v2680_v10, %v926_v12 }
  0x51   : > { %1269 = vmatpush.msrb.mxu2 %v2540_v42 }
  0x52   : > { %v928_v14 = vadd.f32 %v2680_v10, %v927_v13 }
  0x53   : > { %922 = vadd.xlane.f32.xlu0 %v921_v8  ;;  %1270 = vmatpush.msrb.mxu2 %v2539_v44  ;;  %v2662_v8 = vld [vmem:[%s3411_s4] ss:$0 sm:$0xff] }
  0x54   : > { %v3017_v15 = vsel %vm929_vm2, %v2680_v10, %v928_v14  ;;  %v2534_v14 = vld [vmem:[%s2936_s23 + $0x38] sm:$0xff] }
  0x55   : > { %1271 = vmatpush.msrb.mxu2 %v2538_v46 }
  0xbe   : > { %v920_v16 = vpop.xlane.xlu0 %919 }
  0xbf   : > { %v931_v17 = vmul.f32 %v3017_v15, %v920_v16 }
  0xc1   : > { %v3021_v18 = vsub.f32 %v3009_v5, %v931_v17  ;;  %v2533_v17 = vld [vmem:[%s2936_s23 + $0x30] sm:$0xff] }
  0xc3   : > { %v935_v19 = vmul.f32 %v3021_v18, %v3021_v18 }
  0xc5   : > { %v937_v20 = vsel %vm917_vm1, %v935_v19, 0.0  ;;  %v2532_v19 = vld [vmem:[%s2936_s23 + $0x28] sm:$0xff] }
  0xc6   : > { %938 = vadd.xlane.f32.xlu1 %v937_v20  ;;  %v923_v21 = vpop.xlane.xlu0 %922 }
  0xc7   : > { %v932_v22 = vmul.f32 %v3017_v15, %v923_v21 }
  0xc9   : > { %v3028_v23 = vsub.f32 %v3013_v7, %v932_v22 }
  0xcb   : > { %v936_v24 = vmul.f32 %v3028_v23, %v3028_v23 }
  0xcd   : > { %v940_v25 = vsel %vm917_vm1, %v936_v24, 0.0 }
  0xce   : > { %941 = vadd.xlane.f32.xlu1 %v940_v25 }
 0x139   : > { %v939_v38 = vpop.xlane.xlu1 %938 }
 0x13a   : > { %v943_v39 = vmul.f32 %v939_v38, %v3017_v15 }
 0x13c   : > { %v945_v40 = vadd.f32 1e-05, %v943_v39 }
 0x13e   : > { %2681 = vrsqrt.f32 %v945_v40  ;;  %vm953_vm4 = vweird.f32 %v945_v40 }
 0x141   : > { %v942_v43 = vpop.xlane.xlu1 %941 }
 0x142   : > { %v944_v45 = vmul.f32 %v942_v43, %v3017_v15 }
 0x144   : > { %v2682_v47 = vpop.eup %2681  ;;  %v946_v48 = vadd.f32 1e-05, %v944_v45 }
 0x145   : > { %v948_v49 = vmul.f32 %v2682_v47, %v945_v40  ;;  %vm954_vm3 = vweird.f32 %v2682_v47 }
 0x146   : > { %2683 = vrsqrt.f32 %v946_v48  ;;  %vm955_vm5 = vmor %vm953_vm4, %vm954_vm3  ;;  %vm963_vm7 = vweird.f32 %v946_v48 }
 0x147   : > { %v949_v50 = vmul.f32 %v2682_v47, %v948_v49 }
 0x149   : > { %v950_v51 = vmul.f32 0.5, %v949_v50  ;;  %v2548_v50 = vld [vmem:[%s2956_s28 + $0x38] sm:$0xff] }
 0x14b   : > { %v951_v52 = vsub.f32 1.5, %v950_v51  ;;  %v2547_v51 = vld [vmem:[%s2956_s28 + $0x30] sm:$0xff] }
 0x14c   : > { %v2684_v53 = vpop.eup %2683 }
 0x14d   : > { %v952_v54 = vmul.f32 %v2682_v47, %v951_v52  ;;  %v958_v55 = vmul.f32 %v2684_v53, %v946_v48  ;;  %vm964_vm6 = vweird.f32 %v2684_v53  ;;  %v2546_v52 = vld [vmem:[%s2956_s28 + $0x28] sm:$0xff] }
 0x14e   : > { %vm965_vm8 = vmor %vm963_vm7, %vm964_vm6 }
 0x14f   : > { %v956_v57 = vsel %vm955_vm5, %v2682_v47, %v952_v54  ;;  %v959_v58 = vmul.f32 %v2684_v53, %v958_v55 }
 0x150   : > { %v967_v60 = vmul.f32 %v956_v57, %v3021_v18  ;;  %v2664_v18 = vld [vmem:[%s2961_s22] ss:$0 sm:$0xff] }
 0x151   : > { %v960_v61 = vmul.f32 0.5, %v959_v58 }
 0x152   : > { %v972_v62 = vmul.f32 %v2660_v56, %v967_v60 }
 0x153   : > { %v961_v63 = vsub.f32 1.5, %v960_v61 }
 0x154   : > { %v3062_v0 = vadd.f32 %v2661_v59, %v972_v62 }
 0x155   : > { %v962_v1 = vmul.f32 %v2684_v53, %v961_v63 }
 0x156   : > { %2519 = vmatmul.msk.f32.vlgmr.msra.gmra.mxu0 %vm917_vm1, %v3062_v0  ;;  %2521 = vmatmul.msk.f32.vlgmr.msra.gmra.mxu1 %vm917_vm1, %v3062_v0 }
 0x157   : > { %v966_v2 = vsel %vm965_vm8, %v2684_v53, %v962_v1  ;;  %2523 = vmatmul.msk.f32.vlgmr.msra.gmra.mxu2 %vm917_vm1, %v3062_v0  ;;  %v2545_v53 = vld [vmem:[%s2956_s28 + $0x20] sm:$0xff] }
 0x158   : > { %v968_v3 = vmul.f32 %v966_v2, %v3028_v23  ;;  %v2531_v23 = vld [vmem:[%s2936_s23 + $0x20] sm:$0xff] }
 0x15a   : > { %v973_v4 = vmul.f32 %v2660_v56, %v968_v3  ;;  %v2666_v3 = vld [vmem:[%s3411_s4 + $0x1] ss:$0 sm:$0xff] }
 0x15c   : > { %v3071_v6 = vadd.f32 %v2661_v59, %v973_v4  ;;  %v2665_v59 = vld [vmem:[%s2951_s26 + $0x1] ss:$0 sm:$0xff] }
 0x15e   : > { %2520 = vmatmul.msk.f32.gmra.mxu0 %vm917_vm1, %v3071_v6  ;;  %2522 = vmatmul.msk.f32.gmra.mxu1 %vm917_vm1, %v3071_v6 }
 0x15f   : > { %2524 = vmatmul.msk.f32.gmra.mxu2 %vm917_vm1, %v3071_v6 }
 0x167   : > { %2543 = vmatmul.msk.f32.vlgmr.msrb.gmra.mxu2 %vm917_vm1, %v3062_v0 }
 0x16f   : > { %2544 = vmatmul.msk.f32.gmra.mxu2 %vm917_vm1, %v3071_v6 }
 0x1d3   : > { %v1015_v10 = vpop.f32.mrf.mxu0  ;;  %v1048_v11 = vpop.f32.mrf.mxu1 }
 0x1d4   : > { %v1016_v12 = vadd.f32 %v2662_v8, %v1015_v10  ;;  %v1049_v13 = vadd.f32 %v2663_v9, %v1048_v11 }
 0x1d6   : > { %v1021_v16 = vmul.f32 0.35355338, %v1016_v12  ;;  %2525 = vmatpush.xpose.msk.msrb.mxu1 %vm1085_vm9, %v1049_v13  ;;  %v1210_v12 = vld [vmem:[%s2971_s6] sm:$0xff] }
 0x1d9   : > { %2526 = vmatmul.msk.f32.vlgmr.msrb.gmra.mxu1 %vm1085_vm9, %v1021_v16  ;;  %v2667_v16 = vld [vmem:[%s2961_s22 + $0x1] ss:$0 sm:$0xff] }
 0x1da   : > { %1233 = vmatpush.msra.mxu1 %v2534_v14  ;;  %v1079_v20 = vpop.f32.mrf.mxu2 }
 0x1db   : > { %v1018_v21 = vpop.f32.mrf.mxu0  ;;  %v1051_v22 = vpop.f32.mrf.mxu1  ;;  %v1080_v26 = vadd.f32 %v2664_v18, %v1079_v20 }
 0x1dc   : > { %1234 = vmatpush.msra.mxu1 %v2533_v17  ;;  %v1019_v24 = vadd.f32 %v2662_v8, %v1018_v21  ;;  %v1052_v25 = vadd.f32 %v2663_v9, %v1051_v22 }
 0x1de   : > { %1235 = vmatpush.msra.mxu1 %v2532_v19  ;;  %v1022_v27 = vmul.f32 0.35355338, %v1019_v24  ;;  %2527 = vmatpush.xpose.msk.msra.mxu3 %vm1085_vm9, %v1052_v25 }
 0x1e0   : > { %1236 = vmatpush.msra.mxu1 %v2531_v23 }
 0x1e1   : > { %2528 = vmatmul.msk.f32.vlgmr.msra.gmra.mxu3 %vm1085_vm9, %v1022_v27  ;;  %2536 = vmatmul.msk.f32.vlgmr.msra.gmra.mxu1 %vm917_vm1, %v3062_v0 }
 0x1e2   : > { %1182 = vmatpush.msrb.mxu3 %v1080_v26  ;;  %v1082_v28 = vpop.f32.mrf.mxu2 }
 0x1e3   : > { %v1083_v29 = vadd.f32 %v2664_v18, %v1082_v28 }
 0x1e5   : > { %1205 = vmatpush.msrb.mxu0 %v1083_v29 }
 0x1e7   : > { %1301 = vmatpush.msra.mxu0 %v2548_v50 }
 0x1e9   : > { %2537 = vmatmul.msk.f32.gmra.mxu1 %vm917_vm1, %v3071_v6  ;;  %1302 = vmatpush.msra.mxu0 %v2547_v51 }
 0x1ea   : > { %v1273_v58 = vpop.f32.mrf.mxu2 }
 0x1eb   : > { %1303 = vmatpush.msra.mxu0 %v2546_v52  ;;  %v1274_v62 = vadd.f32 %v2665_v59, %v1273_v58  ;;  %v2603_v58 = vld [vmem:[%s2946_s24 + $0x78] sm:$0xff] }
 0x1ed   : > { %1304 = vmatpush.msra.mxu0 %v2545_v53  ;;  %v2558_v53 = vld [vmem:[%s2971_s6 + $0x8] sm:$0xff] }
 0x1ee   : > { %1457 = vmatpush.msra.mxu3 %v2558_v53  ;;  %v2610_v53 = vld [vmem:[%s2956_s28 + $0x78] sm:$0xff] }
 0x1f2   : > { %v1276_v63 = vpop.f32.mrf.mxu2 }
 0x1f3   : > { %v1277_v1 = vadd.f32 %v2665_v59, %v1276_v63 }
 0x256   : > { %v1109_v34 = vpop.f32.mrf.mxu1 }
 0x257   : > { %v1140_v35 = vsel %vm3101_vm10, %v1109_v34, -1e+30 }
 0x258   : > { %v1142_v36 = vsel %vm1085_vm9, %v1140_v35, -inf }
 0x259   : > { %1143 = vmax.xlane.f32.xlu0 %v1142_v36 }
 0x25e   : > { %v1238_v2 = vpop.f32.mrf.mxu1 }
 0x25f   : > { %v1239_v4 = vadd.f32 %v2666_v3, %v1238_v2  ;;  %v2668_v2 = vld [vmem:[%s3411_s4 + $0x2] ss:$0 sm:$0xff] }
 0x261   : > { %v1244_v8 = vmul.f32 0.35355338, %v1239_v4 }
 0x264   : > { %v1135_v37 = vpop.f32.mrf.mxu3 }
 0x265   : > { %v1141_v38 = vsel %vm3101_vm10, %v1135_v37, -1e+30 }
 0x266   : > { %v1145_v39 = vsel %vm1085_vm9, %v1141_v38, -inf  ;;  %v1241_v9 = vpop.f32.mrf.mxu1 }
 0x267   : > { %1146 = vmax.xlane.f32.xlu2 %v1145_v39  ;;  %v1242_v10 = vadd.f32 %v2666_v3, %v1241_v9  ;;  %v2566_v39 = vld [vmem:[%s2936_s23 + $0x58] sm:$0xff]  ;;  %v2669_v3 = vld [vmem:[%s2951_s26 + $0x2] ss:$0 sm:$0xff] }
 0x269   : > { %v1245_v11 = vmul.f32 0.35355338, %v1242_v10 }
 0x2cc   : > { %v1144_v40 = vpop.xlane.xlu0 %1143 }
 0x2cd   : > { %v1148_v41 = vsub.f32 %v1140_v35, %v1144_v40  ;;  %v2565_v40 = vld [vmem:[%s2936_s23 + $0x50] sm:$0xff] }
 0x2cf   : > { %v1150_v42 = vmul.f32 1.442695, %v1148_v41  ;;  %v2564_v41 = vld [vmem:[%s2936_s23 + $0x48] sm:$0xff] }
 0x2d1   : > { %2685 = vpow2.f32 %v1150_v42  ;;  %v2563_v42 = vld [vmem:[%s2936_s23 + $0x40] sm:$0xff] }
 0x2d7   : > { %v2686_v43 = vpop.eup %2685 }
 0x2d8   : > { %v1154_v44 = vsel %vm1085_vm9, %v2686_v43, 0.0 }
 0x2d9   : > { %1155 = vadd.xlane.f32.xlu0 %v1154_v44  ;;  %v2572_v44 = vld [vmem:[%s2946_s24 + $0x50] sm:$0xff] }
 0x2da   : > { %v1147_v45 = vpop.xlane.xlu2 %1146 }
 0x2db   : > { %v1149_v46 = vsub.f32 %v1141_v38, %v1147_v45  ;;  %v2571_v45 = vld [vmem:[%s2946_s24 + $0x48] sm:$0xff] }
 0x2dd   : > { %v1152_v47 = vmul.f32 1.442695, %v1149_v46  ;;  %v2570_v46 = vld [vmem:[%s2946_s24 + $0x40] sm:$0xff] }
 0x2df   : > { %2687 = vpow2.f32 %v1152_v47 }
 0x2e5   : > { %v2688_v48 = vpop.eup %2687 }
 0x2e6   : > { %v1157_v49 = vsel %vm1085_vm9, %v2688_v48, 0.0 }
 0x2e7   : > { %1158 = vadd.xlane.f32.xlu2 %v1157_v49 }
 0x34c   : > { %v1156_v54 = vpop.xlane.xlu0 %1155 }
 0x34d   : > { %2689 = vrcp.f32 %v1156_v54  ;;  %v2580_v54 = vld [vmem:[%s2956_s28 + $0x58] sm:$0xff] }
 0x353   : > { %v2690_v55 = vpop.eup %2689 }
 0x354   : > { %v1162_v56 = vmul.f32 %v2690_v55, %v2686_v43  ;;  %v2573_v43 = vld [vmem:[%s2946_s24 + $0x58] sm:$0xff]  ;;  %v2579_v55 = vld [vmem:[%s2956_s28 + $0x50] sm:$0xff] }
 0x356   : > { %2529 = vmatmul.msk.f32.vlgmr.msrb.gmra.mxu3 %vm1085_vm9, %v1162_v56  ;;  %v2578_v56 = vld [vmem:[%s2956_s28 + $0x48] sm:$0xff] }
 0x357   : > { %1584 = vmatpush.msrb.mxu3 %v2580_v54  ;;  %v2609_v54 = vld [vmem:[%s2956_s28 + $0x70] sm:$0xff] }
 0x359   : > { %1585 = vmatpush.msrb.mxu3 %v2579_v55  ;;  %v2608_v55 = vld [vmem:[%s2956_s28 + $0x68] sm:$0xff] }
 0x35a   : > { %v1159_v57 = vpop.xlane.xlu2 %1158 }
 0x35b   : > { %2691 = vrcp.f32 %v1159_v57  ;;  %1586 = vmatpush.msrb.mxu3 %v2578_v56  ;;  %v2577_v57 = vld [vmem:[%s2956_s28 + $0x40] sm:$0xff] }
 0x35c   : > { %v2607_v56 = vld [vmem:[%s2956_s28 + $0x60] sm:$0xff] }
 0x35d   : > { %1587 = vmatpush.msrb.mxu3 %v2577_v57 }
 0x361   : > { %v2692_v60 = vpop.eup %2691 }
 0x362   : > { %v1163_v61 = vmul.f32 %v2692_v60, %v2688_v48  ;;  %v2602_v60 = vld [vmem:[%s2946_s24 + $0x70] sm:$0xff] }
 0x364   : > { %2530 = vmatmul.msk.f32.vlgmr.msrb.gmra.mxu0 %vm1085_vm9, %v1163_v61  ;;  %v2601_v61 = vld [vmem:[%s2946_s24 + $0x68] sm:$0xff] }
 0x365   : > { %2552 = vmatpush.xpose.msk.msrb.mxu0 %vm1085_vm9, %v1274_v62  ;;  %v2600_v62 = vld [vmem:[%s2946_s24 + $0x60] sm:$0xff] }
 0x36c   : > { %2550 = vmatmul.msk.f32.vlgmr.msra.gmra.mxu0 %vm917_vm1, %v3062_v0 }
 0x36d   : > { %2554 = vmatpush.xpose.msk.msra.mxu0 %vm1085_vm9, %v1277_v1 }
 0x374   : > { %2551 = vmatmul.msk.f32.gmra.mxu0 %vm917_vm1, %v3071_v6 }
 0x37c   : > { %2553 = vmatmul.msk.f32.vlgmr.msrb.gmra.mxu0 %vm1085_vm9, %v1244_v8 }
 0x37d   : > { %1486 = vmatpush.msrb.mxu0 %v1210_v12 }
 0x384   : > { %2555 = vmatmul.msk.f32.vlgmr.msra.gmra.mxu0 %vm1085_vm9, %v1245_v11 }
 0x3d9   : > { %v1184_v13 = vpop.f32.mrf.mxu3 }
 0x3da   : > { %2561 = vmatmul.msk.f32.vlgmr.msrb.gmra.mxu0 %vm1085_vm9, %v1184_v13 }
 0x3e1   : > { %v1207_v14 = vpop.f32.mrf.mxu0 }
 0x3e2   : > { %2562 = vmatmul.msk.f32.gmra.mxu0 %vm1085_vm9, %v1207_v14 }
 0x3e9   : > { %v1306_v17 = vpop.f32.mrf.mxu0 }
 0x3ea   : > { %v1307_v18 = vadd.f32 %v2667_v16, %v1306_v17 }
 0x3ec   : > { %1406 = vmatpush.msrb.mxu1 %v1307_v18 }
 0x3ee   : > { %1516 = vmatpush.msra.mxu1 %v2566_v39 }
 0x3f0   : > { %1517 = vmatpush.msra.mxu1 %v2565_v40 }
 0x3f1   : > { %v1309_v19 = vpop.f32.mrf.mxu0 }
 0x3f2   : > { %v1310_v20 = vadd.f32 %v2667_v16, %v1309_v19  ;;  %1518 = vmatpush.msra.mxu1 %v2564_v41  ;;  %v2590_v19 = vld [vmem:[%s2971_s6 + $0x10] sm:$0xff] }
 0x3f4   : > { %1429 = vmatpush.msra.mxu2 %v1310_v20  ;;  %1519 = vmatpush.msra.mxu1 %v2563_v42 }
 0x3f6   : > { %1551 = vmatpush.msrb.mxu2 %v2573_v43 }
 0x3f8   : > { %1552 = vmatpush.msrb.mxu2 %v2572_v44 }
 0x3f9   : > { %v1335_v21 = vpop.f32.mrf.mxu0 }
 0x3fa   : > { %v1364_v22 = vsel %vm3101_vm10, %v1335_v21, -1e+30  ;;  %1553 = vmatpush.msrb.mxu2 %v2571_v45 }
 0x3fb   : > { %v1366_v23 = vsel %vm1085_vm9, %v1364_v22, -inf }
 0x3fc   : > { %1367 = vmax.xlane.f32.xlu2 %v1366_v23  ;;  %1554 = vmatpush.msrb.mxu2 %v2570_v46  ;;  %v2670_v23 = vld [vmem:[%s2961_s22 + $0x2] ss:$0 sm:$0xff] }
 0x401   : > { %v1361_v24 = vpop.f32.mrf.mxu0 }
 0x402   : > { %v1365_v25 = vsel %vm3101_vm10, %v1361_v24, -1e+30 }
 0x403   : > { %v1369_v26 = vsel %vm1085_vm9, %v1365_v25, -inf }
 0x404   : > { %1370 = vmax.xlane.f32.xlu1 %v1369_v26 }
 0x457   : > { %v3184_v17 = vpop.f32.mrf.mxu0 }
 0x45f   : > { %v1491_v20 = vpop.f32.mrf.mxu0 }
 0x46f   : > { %v1368_v27 = vpop.xlane.xlu2 %1367 }
 0x470   : > { %v1372_v28 = vsub.f32 %v1364_v22, %v1368_v27 }
 0x472   : > { %v1374_v29 = vmul.f32 1.442695, %v1372_v28 }
 0x474   : > { %2693 = vpow2.f32 %v1374_v29 }
 0x477   : > { %v1371_v30 = vpop.xlane.xlu1 %1370 }
 0x478   : > { %v1373_v32 = vsub.f32 %v1365_v25, %v1371_v30 }
 0x47a   : > { %v2694_v34 = vpop.eup %2693  ;;  %v1376_v35 = vmul.f32 1.442695, %v1373_v32 }
 0x47b   : > { %v1378_v36 = vsel %vm1085_vm9, %v2694_v34, 0.0 }
 0x47c   : > { %2695 = vpow2.f32 %v1376_v35  ;;  %1379 = vadd.xlane.f32.xlu2 %v1378_v36  ;;  %v2671_v36 = vld [vmem:[%s2951_s26 + $0x3] ss:$0 sm:$0xff]  ;;  %s3414_s26 = sld [smem:[#allocation23_spill]] }
 0x482   : > { %v2696_v37 = vpop.eup %2695  ;;  %s3415_s28 = scalar_lea.vmem %s3414_s26, %s2921_s16 }
 0x483   : > { %v1381_v38 = vsel %vm1085_vm9, %v2696_v37, 0.0 }
 0x484   : > { %1382 = vadd.xlane.f32.xlu1 %v1381_v38 }
 0x4ef   : > { %v1380_v47 = vpop.xlane.xlu2 %1379 }
 0x4f0   : > { %2697 = vrcp.f32 %v1380_v47 }
 0x4f6   : > { %v2698_v48 = vpop.eup %2697 }
 0x4f7   : > { %v1386_v49 = vmul.f32 %v2698_v48, %v2694_v34  ;;  %v1383_v50 = vpop.xlane.xlu1 %1382 }
 0x4f8   : > { %2699 = vrcp.f32 %v1383_v50  ;;  %v2595_v50 = vld [vmem:[%s2936_s23 + $0x70] sm:$0xff] }
 0x4f9   : > { %2556 = vmatmul.msk.f32.vlgmr.msrb.gmra.mxu1 %vm1085_vm9, %v1386_v49  ;;  %v2596_v49 = vld [vmem:[%s2936_s23 + $0x78] sm:$0xff] }
 0x4fe   : > { %v2700_v51 = vpop.eup %2699 }
 0x4ff   : > { %v1387_v52 = vmul.f32 %v2700_v51, %v2696_v37  ;;  %v2594_v51 = vld [vmem:[%s2936_s23 + $0x68] sm:$0xff] }
 0x501   : > { %2557 = vmatmul.msk.f32.vlgmr.msra.gmra.mxu2 %vm1085_vm9, %v1387_v52  ;;  %2568 = vmatmul.msk.f32.vlgmr.msra.gmra.mxu1 %vm917_vm1, %v3062_v0  ;;  %v2593_v52 = vld [vmem:[%s2936_s23 + $0x60] sm:$0xff] }
 0x509   : > { %2569 = vmatmul.msk.f32.gmra.mxu1 %vm917_vm1, %v3071_v6  ;;  %2575 = vmatmul.msk.f32.vlgmr.msrb.gmra.mxu2 %vm917_vm1, %v3062_v0 }
 0x511   : > { %2576 = vmatmul.msk.f32.gmra.mxu2 %vm917_vm1, %v3071_v6 }
 0x576   : > { %v1408_v59 = vpop.f32.mrf.mxu1 }
 0x577   : > { %2559 = vmatmul.msk.f32.vlgmr.msra.gmra.mxu3 %vm1085_vm9, %v1408_v59 }
 0x578   : > { %1807 = vmatpush.msra.mxu3 %v2603_v58 }
 0x57a   : > { %1808 = vmatpush.msra.mxu3 %v2602_v60 }
 0x57c   : > { %1809 = vmatpush.msra.mxu3 %v2601_v61 }
 0x57e   : > { %1810 = vmatpush.msra.mxu3 %v2600_v62  ;;  %v1521_v1 = vpop.f32.mrf.mxu1 }
 0x57f   : > { %v1522_v4 = vadd.f32 %v2668_v2, %v1521_v1 }
 0x581   : > { %v1527_v10 = vmul.f32 0.35355338, %v1522_v4  ;;  %v2672_v4 = vld [vmem:[%s3411_s4 + $0x3] ss:$0 sm:$0xff] }
 0x584   : > { %v1431_v63 = vpop.f32.mrf.mxu2 }
 0x585   : > { %2560 = vmatmul.msk.f32.gmra.mxu3 %vm1085_vm9, %v1431_v63 }
 0x586   : > { %v1524_v11 = vpop.f32.mrf.mxu1 }
 0x587   : > { %v1525_v12 = vadd.f32 %v2668_v2, %v1524_v11 }
 0x589   : > { %v1528_v16 = vmul.f32 0.35355338, %v1525_v12 }
 0x58c   : > { %v1556_v8 = vpop.f32.mrf.mxu2 }
 0x58d   : > { %v1557_v9 = vadd.f32 %v2669_v3, %v1556_v8  ;;  %2582 = vmatmul.msk.f32.vlgmr.msrb.gmra.mxu3 %vm917_vm1, %v3062_v0  ;;  %v2673_v8 = vld [vmem:[%s2961_s22 + $0x3] ss:$0 sm:$0xff] }
 0x58f   : > { %2584 = vmatpush.xpose.msk.msra.mxu0 %vm1085_vm9, %v1557_v9 }
 0x592   : > { %2585 = vmatmul.msk.f32.vlgmr.msra.gmra.mxu0 %vm1085_vm9, %v1527_v10 }
 0x594   : > { %v1559_v13 = vpop.f32.mrf.mxu2 }
 0x595   : > { %v1560_v14 = vadd.f32 %v2669_v3, %v1559_v13  ;;  %2583 = vmatmul.msk.f32.gmra.mxu3 %vm917_vm1, %v3071_v6 }
 0x597   : > { %2586 = vmatpush.xpose.msk.msrb.mxu1 %vm1085_vm9, %v1560_v14 }
 0x59a   : > { %2587 = vmatmul.msk.f32.vlgmr.msrb.gmra.mxu1 %vm1085_vm9, %v1528_v16 }
 0x59b   : > { %1740 = vmatpush.msra.mxu1 %v2590_v19 }
 0x59d   : > { %2605 = vmatmul.msk.f32.vlgmr.msra.gmra.mxu3 %vm917_vm1, %v3062_v0 }
 0x5a5   : > { %2606 = vmatmul.msk.f32.gmra.mxu3 %vm917_vm1, %v3071_v6 }
 0x5fa   : > { %v3186_v18 = vpop.f32.mrf.mxu3 }
 0x608   : > { %v1462_v21 = vpop.f32.mrf.mxu3 }
 0x609   : > { %v3189_v22 = vadd.f32 %v1491_v20, %v1462_v21  ;;  %v1489_v20 = vadd.f32 %v3184_v17, %v3186_v18 }
 0x60f   : > { %v1618_v24 = vpop.f32.mrf.mxu0 }
 0x610   : > { %v1647_v25 = vsel %vm3101_vm10, %v1618_v24, -1e+30  ;;  %v1589_v26 = vpop.f32.mrf.mxu3 }
 0x611   : > { %v1590_v27 = vadd.f32 %v2670_v23, %v1589_v26  ;;  %v1649_v28 = vsel %vm1085_vm9, %v1647_v25, -inf }
 0x612   : > { %1650 = vmax.xlane.f32.xlu0 %v1649_v28 }
 0x613   : > { %1689 = vmatpush.msra.mxu2 %v1590_v27 }
 0x615   : > { %1772 = vmatpush.msrb.mxu2 %v2596_v49 }
 0x617   : > { %v1644_v29 = vpop.f32.mrf.mxu1  ;;  %1773 = vmatpush.msrb.mxu2 %v2595_v50 }
 0x618   : > { %v1648_v30 = vsel %vm3101_vm10, %v1644_v29, -1e+30  ;;  %v1592_v32 = vpop.f32.mrf.mxu3 }
 0x619   : > { %v1593_v34 = vadd.f32 %v2670_v23, %v1592_v32  ;;  %v1652_v35 = vsel %vm1085_vm9, %v1648_v30, -inf  ;;  %1774 = vmatpush.msrb.mxu2 %v2594_v51  ;;  %v2674_v51 = vld [vmem:[%s3415_s28] ss:$0 sm:$0xff] }
 0x61a   : > { %1653 = vmax.xlane.f32.xlu1 %v1652_v35 }
 0x61b   : > { %1712 = vmatpush.msrb.mxu0 %v1593_v34  ;;  %1775 = vmatpush.msrb.mxu2 %v2593_v52 }
 0x61d   : > { %1840 = vmatpush.msra.mxu0 %v2610_v53 }
 0x61f   : > { %1841 = vmatpush.msra.mxu0 %v2609_v54 }
 0x620   : > { %v1812_v37 = vpop.f32.mrf.mxu3 }
 0x621   : > { %v1813_v38 = vadd.f32 %v2671_v36, %v1812_v37  ;;  %1842 = vmatpush.msra.mxu0 %v2608_v55 }
 0x623   : > { %2614 = vmatpush.xpose.msk.msrb.mxu1 %vm1085_vm9, %v1813_v38  ;;  %1843 = vmatpush.msra.mxu0 %v2607_v56 }
 0x628   : > { %v1815_v58 = vpop.f32.mrf.mxu3 }
 0x629   : > { %v1816_v62 = vadd.f32 %v2671_v36, %v1815_v58 }
 0x685   : > { %v1651_v39 = vpop.xlane.xlu0 %1650 }
 0x686   : > { %v1655_v40 = vsub.f32 %v1647_v25, %v1651_v39 }
 0x688   : > { %v1657_v41 = vmul.f32 1.442695, %v1655_v40 }
 0x68a   : > { %2701 = vpow2.f32 %v1657_v41 }
 0x68d   : > { %v1654_v42 = vpop.xlane.xlu1 %1653 }
 0x68e   : > { %v1656_v43 = vsub.f32 %v1648_v30, %v1654_v42 }
 0x690   : > { %v2702_v44 = vpop.eup %2701  ;;  %v1659_v45 = vmul.f32 1.442695, %v1656_v43 }
 0x691   : > { %v1661_v46 = vsel %vm1085_vm9, %v2702_v44, 0.0 }
 0x692   : > { %2703 = vpow2.f32 %v1659_v45  ;;  %1662 = vadd.xlane.f32.xlu2 %v1661_v46  ;;  %v2620_v46 = vld [vmem:[%s2971_s6 + $0x18] sm:$0xff]  ;;  %s3416_s6 = scalar_lea.vmem %s3358_s13, %s2921_s16 }
 0x698   : > { %v2704_v47 = vpop.eup %2703 }
 0x699   : > { %v1664_v48 = vsel %vm1085_vm9, %v2704_v47, 0.0 }
 0x69a   : > { %1665 = vadd.xlane.f32.xlu0 %v1664_v48 }
 0x705   : > { %v1663_v57 = vpop.xlane.xlu2 %1662 }
 0x706   : > { %2705 = vrcp.f32 %v1663_v57 }
 0x70c   : > { %v2706_v59 = vpop.eup %2705 }
 0x70d   : > { %v1669_v60 = vmul.f32 %v2706_v59, %v2702_v44  ;;  %v1666_v61 = vpop.xlane.xlu0 %1665 }
 0x70e   : > { %2707 = vrcp.f32 %v1666_v61 }
 0x70f   : > { %2588 = vmatmul.msk.f32.vlgmr.msra.gmra.mxu2 %vm1085_vm9, %v1669_v60 }
 0x710   : > { %2616 = vmatpush.xpose.msk.msra.mxu2 %vm1085_vm9, %v1816_v62 }
 0x714   : > { %v2708_v63 = vpop.eup %2707 }
 0x715   : > { %v1670_v1 = vmul.f32 %v2708_v63, %v2704_v47 }
 0x717   : > { %2589 = vmatmul.msk.f32.vlgmr.msrb.gmra.mxu0 %vm1085_vm9, %v1670_v1  ;;  %2598 = vmatmul.msk.f32.vlgmr.msrb.gmra.mxu2 %vm917_vm1, %v3062_v0 }
 0x71f   : > { %2599 = vmatmul.msk.f32.gmra.mxu2 %vm917_vm1, %v3071_v6  ;;  %2612 = vmatmul.msk.f32.vlgmr.msra.gmra.mxu0 %vm917_vm1, %v3062_v0 }
 0x727   : > { %2613 = vmatmul.msk.f32.gmra.mxu0 %vm917_vm1, %v3071_v6 }
 0x792   : > { %v1691_v2 = vpop.f32.mrf.mxu2 }
 0x793   : > { %2591 = vmatmul.msk.f32.vlgmr.msra.gmra.mxu1 %vm1085_vm9, %v1691_v2 }
 0x794   : > { %v1714_v3 = vpop.f32.mrf.mxu0  ;;  %1996 = vmatpush.msra.mxu1 %v2620_v46  ;;  %v2158_v46 = vld [vmem:[%s2993_s11 + $0x48] sm:$0xff] }
 0x79a   : > { %v1777_v9 = vpop.f32.mrf.mxu2 }
 0x79b   : > { %2592 = vmatmul.msk.f32.gmra.mxu1 %vm1085_vm9, %v1714_v3  ;;  %v1778_v11 = vadd.f32 %v2672_v4, %v1777_v9  ;;  %v2072_v9 = vld [vmem:[%s2984_s10 + $0x10] sm:$0xff] }
 0x79c   : > { %v1845_v10 = vpop.f32.mrf.mxu0 }
 0x79d   : > { %v1846_v12 = vadd.f32 %v2673_v8, %v1845_v10  ;;  %v1783_v13 = vmul.f32 0.35355338, %v1778_v11  ;;  %v2071_v10 = vld [vmem:[%s2984_s10 + $0x8] sm:$0xff]  ;;  %v2070_v11 = vld [vmem:[%s2984_s10] sm:$0xff] }
 0x79f   : > { %1945 = vmatpush.msrb.mxu3 %v1846_v12 }
 0x7a2   : > { %v1780_v14 = vpop.f32.mrf.mxu2 }
 0x7a3   : > { %v1781_v16 = vadd.f32 %v2672_v4, %v1780_v14  ;;  %2615 = vmatmul.msk.f32.vlgmr.msrb.gmra.mxu1 %vm1085_vm9, %v1783_v13 }
 0x7a4   : > { %v1848_v0 = vpop.f32.mrf.mxu0 }
 0x7a5   : > { %v1784_v6 = vmul.f32 0.35355338, %v1781_v16  ;;  %v1849_v19 = vadd.f32 %v2673_v8, %v1848_v0  ;;  %v2073_v8 = vld [vmem:[%s2984_s10 + $0x18] sm:$0xff]  ;;  %s3420_s10 = sld [smem:[#allocation25_spill]] (!%p2627_p5) }
 0x7a6   : > { %2096 = vmatpush.msrb.mxu2 %v2073_v8 }
 0x7a7   : > { %2617 = vmatmul.msk.f32.vlgmr.msra.gmra.mxu2 %vm1085_vm9, %v1784_v6  ;;  %1968 = vmatpush.msrb.mxu0 %v1849_v19 }
 0x7a8   : > { %2097 = vmatpush.msrb.mxu2 %v2072_v9 }
 0x7aa   : > { %2098 = vmatpush.msrb.mxu2 %v2071_v10 }
 0x7ac   : > { %2099 = vmatpush.msrb.mxu2 %v2070_v11 }
 0x810   : > { %v1742_v21 = vpop.f32.mrf.mxu1 }
 0x811   : > { %v1748_v23 = vadd.f32 %v1742_v21, %v1489_v20 }
 0x818   : > { %v1745_v24 = vpop.f32.mrf.mxu1 }
 0x819   : > { %v1749_v25 = vadd.f32 %v1745_v24, %v3189_v22 }
 0x820   : > { %v1874_v26 = vpop.f32.mrf.mxu1 }
 0x821   : > { %v1903_v27 = vsel %vm3101_vm10, %v1874_v26, -1e+30 }
 0x822   : > { %v1905_v28 = vsel %vm1085_vm9, %v1903_v27, -inf }
 0x823   : > { %1906 = vmax.xlane.f32.xlu1 %v1905_v28  ;;  %v2675_v28 = vld [vmem:[%s3416_s6] ss:$0 sm:$0xff] }
 0x82a   : > { %v1900_v29 = vpop.f32.mrf.mxu2 }
 0x82b   : > { %v1904_v30 = vsel %vm3101_vm10, %v1900_v29, -1e+30 }
 0x82c   : > { %v1908_v32 = vsel %vm1085_vm9, %v1904_v30, -inf }
 0x82d   : > { %1909 = vmax.xlane.f32.xlu2 %v1908_v32 }
 0x896   : > { %v1907_v17 = vpop.xlane.xlu1 %1906 }
 0x897   : > { %v1911_v18 = vsub.f32 %v1903_v27, %v1907_v17  ;;  %v2676_v17 = vld [vmem:[%s3417_s5] ss:$0 sm:$0xff] }
 0x899   : > { %v1913_v34 = vmul.f32 1.442695, %v1911_v18 }
 0x89b   : > { %2709 = vpow2.f32 %v1913_v34 }
 0x8a0   : > { %v1910_v35 = vpop.xlane.xlu2 %1909 }
 0x8a1   : > { %v2710_v22 = vpop.eup %2709  ;;  %v1912_v36 = vsub.f32 %v1904_v30, %v1910_v35 }
 0x8a2   : > { %v1917_v37 = vsel %vm1085_vm9, %v2710_v22, 0.0 }
 0x8a3   : > { %v1915_v38 = vmul.f32 1.442695, %v1912_v36  ;;  %1918 = vadd.xlane.f32.xlu0 %v1917_v37 }
 0x8a5   : > { %2711 = vpow2.f32 %v1915_v38 }
 0x8ab   : > { %v2712_v39 = vpop.eup %2711 }
 0x8ac   : > { %v1920_v33 = vsel %vm1085_vm9, %v2712_v39, 0.0 }
 0x8ad   : > { %1921 = vadd.xlane.f32.xlu1 %v1920_v33 }
 0x916   : > { %v1919_v40 = vpop.xlane.xlu0 %1918 }
 0x917   : > { %2713 = vrcp.f32 %v1919_v40  ;;  %v2164_v40 = vld [vmem:[%s2993_s11 + $0x78] sm:$0xff] }
 0x918   : > { %2165 = vmatpush.msra.mxu3 %v2164_v40 }
 0x91d   : > { %v2714_v41 = vpop.eup %2713 }
 0x91e   : > { %v1925_v42 = vmul.f32 %v2714_v41, %v2710_v22  ;;  %v2163_v41 = vld [vmem:[%s2993_s11 + $0x70] sm:$0xff] }
 0x91f   : > { %2166 = vmatpush.msra.mxu3 %v2163_v41 }
 0x920   : > { %2618 = vmatmul.msk.f32.vlgmr.msrb.gmra.mxu3 %vm1085_vm9, %v1925_v42  ;;  %v1922_v43 = vpop.xlane.xlu1 %1921  ;;  %v2162_v42 = vld [vmem:[%s2993_s11 + $0x68] sm:$0xff] }
 0x921   : > { %2715 = vrcp.f32 %v1922_v43  ;;  %2167 = vmatpush.msra.mxu3 %v2162_v42  ;;  %v2161_v43 = vld [vmem:[%s2993_s11 + $0x60] sm:$0xff] }
 0x923   : > { %2168 = vmatpush.msra.mxu3 %v2161_v43 }
 0x927   : > { %v2716_v44 = vpop.eup %2715 }
 0x928   : > { %v1926_v45 = vmul.f32 %v2716_v44, %v2712_v39  ;;  %v2160_v44 = vld [vmem:[%s2993_s11 + $0x58] sm:$0xff] }
 0x929   : > { %2169 = vmatpush.msra.mxu3 %v2160_v44 }
 0x92a   : > { %2619 = vmatmul.msk.f32.vlgmr.msrb.gmra.mxu0 %vm1085_vm9, %v1926_v45  ;;  %v2159_v45 = vld [vmem:[%s2993_s11 + $0x50] sm:$0xff] }
 0x92b   : > { %2170 = vmatpush.msra.mxu3 %v2159_v45 }
 0x92d   : > { %2171 = vmatpush.msra.mxu3 %v2158_v46 }
 0x9a3   : > { %v1947_v47 = vpop.f32.mrf.mxu3 }
 0x9a4   : > { %2621 = vmatmul.msk.f32.vlgmr.msra.gmra.mxu1 %vm1085_vm9, %v1947_v47  ;;  %v2157_v47 = vld [vmem:[%s2993_s11 + $0x40] sm:$0xff] }
 0x9a5   : > { %2172 = vmatpush.msra.mxu3 %v2157_v47 }
 0x9a7   : > { %v1970_v48 = vpop.f32.mrf.mxu0 }
 0x9ac   : > { %2622 = vmatmul.msk.f32.gmra.mxu1 %vm1085_vm9, %v1970_v48  ;;  %v2156_v48 = vld [vmem:[%s2993_s11 + $0x38] sm:$0xff] }
 0x9ad   : > { %2173 = vmatpush.msra.mxu3 %v2156_v48 }
 0xa21   : > { %v1998_v49 = vpop.f32.mrf.mxu1 }
 0xa22   : > { %v2004_v50 = vadd.f32 %v1998_v49, %v1748_v23  ;;  %v2155_v49 = vld [vmem:[%s2993_s11 + $0x30] sm:$0xff] }
 0xa23   : > { %2174 = vmatpush.msra.mxu3 %v2155_v49 }
 0xa24   : > { %v2006_v52 = vadd.f32 %v2004_v50, %v3009_v5  ;;  %v2154_v50 = vld [vmem:[%s2993_s11 + $0x28] sm:$0xff] }
 0xa25   : > { %2175 = vmatpush.msra.mxu3 %v2154_v50 }
 0xa26   : > { %v3249_v53 = vadd.f32 %v2674_v51, %v2006_v52  ;;  %v2152_v52 = vld [vmem:[%s2993_s11 + $0x18] sm:$0xff] }
 0xa28   : > { %v2016_v54 = vsel %vm917_vm1, %v3249_v53, 0.0 }
 0xa29   : > { %2017 = vadd.xlane.f32.xlu2 %v2016_v54  ;;  %v2001_v55 = vpop.f32.mrf.mxu1  ;;  %v2677_v54 = vld [vmem:[%s892_s12] ss:$0 sm:$0xff] }
 0xa2a   : > { %v2005_v56 = vadd.f32 %v2001_v55, %v1749_v25  ;;  %v2151_v55 = vld [vmem:[%s2993_s11 + $0x10] sm:$0xff] }
 0xa2c   : > { %v2007_v57 = vadd.f32 %v2005_v56, %v3013_v7 }
 0xa2e   : > { %v3254_v58 = vadd.f32 %v2674_v51, %v2007_v57  ;;  %v2153_v51 = vld [vmem:[%s2993_s11 + $0x20] sm:$0xff]  ;;  %v2150_v57 = vld [vmem:[%s2993_s11 + $0x8] sm:$0xff] }
 0xa2f   : > { %2176 = vmatpush.msra.mxu3 %v2153_v51 }
 0xa30   : > { %v2019_v59 = vsel %vm917_vm1, %v3254_v58, 0.0 }
 0xa31   : > { %2020 = vadd.xlane.f32.xlu0 %v2019_v59  ;;  %2177 = vmatpush.msra.mxu3 %v2152_v52 }
 0xa33   : > { %2178 = vmatpush.msra.mxu3 %v2151_v55 }
 0xa35   : > { %2179 = vmatpush.msra.mxu3 %v2150_v57 }
 0xa9c   : > { %v2018_v60 = vpop.xlane.xlu2 %2017 }
 0xa9d   : > { %v2022_v5 = vmul.f32 %v2018_v60, %v3017_v15  ;;  %v2149_v60 = vld [vmem:[%s2993_s11] sm:$0xff] }
 0xa9e   : > { %2180 = vmatpush.msra.mxu3 %v2149_v60 }
 0xa9f   : > { %v2024_v61 = vsub.f32 %v3249_v53, %v2022_v5 }
 0xaa1   : > { %v2026_v62 = vmul.f32 %v2024_v61, %v2024_v61 }
 0xaa3   : > { %v2028_v63 = vsel %vm917_vm1, %v2026_v62, 0.0 }
 0xaa4   : > { %2029 = vadd.xlane.f32.xlu1 %v2028_v63  ;;  %v2021_v7 = vpop.xlane.xlu0 %2020 }
 0xaa5   : > { %v2023_v1 = vmul.f32 %v2021_v7, %v3017_v15 }
 0xaa7   : > { %v2025_v2 = vsub.f32 %v3254_v58, %v2023_v1 }
 0xaa9   : > { %v2027_v3 = vmul.f32 %v2025_v2, %v2025_v2 }
 0xaab   : > { %v2031_v4 = vsel %vm917_vm1, %v2027_v3, 0.0 }
 0xaac   : > { %2032 = vadd.xlane.f32.xlu2 %v2031_v4 }
 0xb17   : > { %v2030_v12 = vpop.xlane.xlu1 %2029 }
 0xb18   : > { %v2034_v13 = vmul.f32 %v2030_v12, %v3017_v15 }
 0xb1a   : > { %v2036_v14 = vadd.f32 1e-05, %v2034_v13 }
 0xb1c   : > { %2717 = vrsqrt.f32 %v2036_v14  ;;  %vm2044_vm12 = vweird.f32 %v2036_v14 }
 0xb1f   : > { %v2033_v16 = vpop.xlane.xlu2 %2032 }
 0xb20   : > { %v2035_v0 = vmul.f32 %v2033_v16, %v3017_v15 }
 0xb22   : > { %v2718_v6 = vpop.eup %2717  ;;  %v2037_v19 = vadd.f32 1e-05, %v2035_v0 }
 0xb23   : > { %v2039_v20 = vmul.f32 %v2718_v6, %v2036_v14  ;;  %vm2045_vm11 = vweird.f32 %v2718_v6 }
 0xb24   : > { %2719 = vrsqrt.f32 %v2037_v19  ;;  %vm2046_vm13 = vmor %vm2044_vm12, %vm2045_vm11  ;;  %vm2054_vm15 = vweird.f32 %v2037_v19 }
 0xb25   : > { %v2040_v21 = vmul.f32 %v2718_v6, %v2039_v20 }
 0xb27   : > { %v2041_v23 = vmul.f32 0.5, %v2040_v21 }
 0xb29   : > { %v2042_v24 = vsub.f32 1.5, %v2041_v23 }
 0xb2a   : > { %v2720_v25 = vpop.eup %2719 }
 0xb2b   : > { %v2043_v26 = vmul.f32 %v2718_v6, %v2042_v24  ;;  %v2049_v27 = vmul.f32 %v2720_v25, %v2037_v19  ;;  %vm2055_vm14 = vweird.f32 %v2720_v25 }
 0xb2c   : > { %vm2056_vm0 = vmor %vm2054_vm15, %vm2055_vm14 }
 0xb2d   : > { %v2047_v29 = vsel %vm2046_vm13, %v2718_v6, %v2043_v26  ;;  %v2050_v30 = vmul.f32 %v2720_v25, %v2049_v27 }
 0xb2e   : > { %v2058_v32 = vmul.f32 %v2047_v29, %v2024_v61 }
 0xb2f   : > { %v2051_v18 = vmul.f32 0.5, %v2050_v30 }
 0xb30   : > { %v2063_v34 = vmul.f32 %v2675_v28, %v2058_v32 }
 0xb31   : > { %v2052_v35 = vsub.f32 1.5, %v2051_v18  ;;  %v2678_v18 = vld [vmem:[%s900_s21] ss:$0 sm:$0xff] }
 0xb32   : > { %v2068_v22 = vadd.f32 %v2676_v17, %v2063_v34 }
 0xb33   : > { %v2053_v36 = vmul.f32 %v2720_v25, %v2052_v35 }
 0xb34   : > { %2623 = vmatmul.msk.f32.vlgmr.msrb.gmra.mxu2 %vm917_vm1, %v2068_v22 }
 0xb35   : > { %v2057_v37 = vsel %vm2056_vm0, %v2720_v25, %v2053_v36 }
 0xb36   : > { %v2059_v38 = vmul.f32 %v2057_v37, %v2025_v2 }
 0xb38   : > { %v2064_v39 = vmul.f32 %v2675_v28, %v2059_v38 }
 0xb3a   : > { %v2069_v33 = vadd.f32 %v2676_v17, %v2064_v39 }
 0xb3c   : > { %2624 = vmatmul.msk.f32.gmra.mxu2 %vm917_vm1, %v2069_v33 }
 0xbb7   : > { %v2101_v56 = vpop.f32.mrf.mxu2 }
 0xbb8   : > { %v2102_v59 = vadd.f32 %v2677_v54, %v2101_v56 }
 0xbba   : > { %v2625_v5 = vmul.f32 -1.702, %v2102_v59 }
 0xbbc   : > { %v2111_v61 = vmul.f32 1.442695, %v2625_v5 }
 0xbbe   : > { %2721 = vpow2.f32 %v2111_v61 }
 0xbbf   : > { %v2104_v62 = vpop.f32.mrf.mxu2 }
 0xbc0   : > { %v2105_v63 = vadd.f32 %v2677_v54, %v2104_v62 }
 0xbc2   : > { %v2626_v7 = vmul.f32 -1.702, %v2105_v63 }
 0xbc4   : > { %v2722_v1 = vpop.eup %2721  ;;  %v2113_v2 = vmul.f32 1.442695, %v2626_v7 }
 0xbc5   : > { %v2115_v3 = vadd.f32 1.0, %v2722_v1 }
 0xbc6   : > { %2723 = vpow2.f32 %v2113_v2 }
 0xbc7   : > { %2725 = vrcp.f32 %v2115_v3  ;;  %v2128_v12 = vand.u32 2147483648, %v2115_v3  ;;  %v2126_v14 = vand.u32 2147483647, %v2115_v3  ;;  %vm2122_vm3 = vweird.f32 %v2115_v3 }
 0xbc9   : > { %v2129_v6 = vor.u32 1.1754944e-38, %v2128_v12  ;;  %vm2127_vm5 = vcmp.eq.f32.partialorder %v2126_v14, 8.507059e+37 }
 0xbcc   : > { %v2724_v4 = vpop.eup %2723 }
 0xbcd   : > { %v2726_v8 = vpop.eup %2725  ;;  %v2116_v9 = vadd.f32 1.0, %v2724_v4 }
 0xbce   : > { %v2118_v10 = vmul.f32 %v2726_v8, %v2115_v3  ;;  %vm2123_vm2 = vweird.f32 %v2726_v8 }
 0xbcf   : > { %2727 = vrcp.f32 %v2116_v9  ;;  %vm2124_vm4 = vmor %vm2122_vm3, %vm2123_vm2  ;;  %v2143_v25 = vand.u32 2147483648, %v2116_v9  ;;  %v2141_v27 = vand.u32 2147483647, %v2116_v9  ;;  %vm2137_vm7 = vweird.f32 %v2116_v9 }
 0xbd0   : > { %v2119_v11 = vsub.f32 1.0, %v2118_v10 }
 0xbd1   : > { %v2144_v29 = vor.u32 1.1754944e-38, %v2143_v25  ;;  %vm2142_vm9 = vcmp.eq.f32.partialorder %v2141_v27, 8.507059e+37 }
 0xbd2   : > { %v2120_v13 = vmul.f32 %v2726_v8, %v2119_v11 }
 0xbd4   : > { %v2121_v16 = vadd.f32 %v2726_v8, %v2120_v13 }
 0xbd5   : > { %v2728_v0 = vpop.eup %2727 }
 0xbd6   : > { %v2125_v19 = vsel %vm2124_vm4, %v2726_v8, %v2121_v16  ;;  %v2133_v20 = vmul.f32 %v2728_v0, %v2116_v9  ;;  %vm2138_vm6 = vweird.f32 %v2728_v0 }
 0xbd7   : > { %v2130_v21 = vsel %vm2127_vm5, %v2129_v6, %v2125_v19  ;;  %vm2139_vm8 = vmor %vm2137_vm7, %vm2138_vm6 }
 0xbd8   : > { %v2147_v23 = vmul.f32 %v2130_v21, %v2102_v59  ;;  %v2134_v24 = vsub.f32 1.0, %v2133_v20 }
 0xbda   : > { %2181 = vmatmul.f32.vlgmr.msra.gmra.mxu3 %v2147_v23  ;;  %v2135_v26 = vmul.f32 %v2728_v0, %v2134_v24 }
 0xbdc   : > { %v2136_v28 = vadd.f32 %v2728_v0, %v2135_v26 }
 0xbde   : > { %v2140_v30 = vsel %vm2139_vm8, %v2728_v0, %v2136_v28 }
 0xbdf   : > { %v2145_v32 = vsel %vm2142_vm9, %v2144_v29, %v2140_v30 }
 0xbe0   : > { %v2148_v17 = vmul.f32 %v2145_v32, %v2105_v63 }
 0xbe2   : > { %2184 = vmatmul.f32.gmra.mxu3 %v2148_v17 }
 0xc5d   : > { %v2182_v34 = vpop.f32.mrf.mxu3 }
 0xc5e   : > { %v2188_v35 = vadd.f32 %v2182_v34, %v3249_v53 }
 0xc60   : > { %v2194_v22 = vadd.f32 %v2678_v18, %v2188_v35 }
 0xc62   : > { %2196 = vst.msk [vmem:[#allocation2] sm:$0xff] %vm917_vm1, %v2194_v22 }
 0xc65   : > { %v2185_v36 = vpop.f32.mrf.mxu3 }
 0xc66   : > { %v2189_v37 = vadd.f32 %v2185_v36, %v3254_v58  ;;  %2201 = sbr.rel (%p2627_p5) target bundleno = 3593 (0xe09), region = 112 }
 0xc68   : > { %v2195_v38 = vadd.f32 %v2678_v18, %v2189_v37 }
 0xc6a   : > { %2197 = vst.msk [vmem:[#allocation2 + $0x8] sm:$0xff] %vm917_vm1, %v2195_v38 }
 0xc6b   : > { %v2203_v39 = vstv %s2202_s7  ;;  %v2216_v33 = vstv %s2629_s20  ;;  %v2789_v40 = vmov 0.0   ;;  %vm2228_vm12 = vcmask 1040384   ;;  %v2266_v7 = vld [vmem:[%s3419_s8 + $0x18] sm:$0xff]  ;;  %v2265_v1 = vld [vmem:[%s3419_s8 + $0x10] sm:$0xff] }
 0xc6c   : > { %vm2204_vm10 = vcmp.eq.s32.totalorder %v3098_v31, %v2203_v39  ;;  %vm2217_vm11 = vcmp.eq.s32.totalorder %v3098_v31, %v2216_v33  ;;  %vm2232_vm13 = vcmask 254976   ;;  %2282 = vmatpush.msra.mxu0 %v2266_v7  ;;  %v2264_v2 = vld [vmem:[%s3419_s8 + $0x8] sm:$0xff]  ;;  %v2263_v3 = vld [vmem:[%s3419_s8] sm:$0xff]  ;;  %vm2290_vm2 = vcmask 123904  }
 0xc6d   : > { %v2628_v53 = vsel %vm2204_vm10, 1.0, %v2789_v40  ;;  %v2630_v42 = vsel %vm2217_vm11, 1.0, %v2789_v40  ;;  %v2729_v0 = vld [vmem:[%s3420_s10] ss:$0 sm:$0xff] }
 0xc6e   : > { %v2207_v41 = vmul.f32 %v2628_v53, %v2194_v22  ;;  %v2220_v43 = vmul.f32 %v2630_v42, %v2195_v38  ;;  %2283 = vmatpush.msra.mxu0 %v2265_v1 }
 0xc70   : > { %v2208_v58 = vsel %vm917_vm1, %v2207_v41, 0.0  ;;  %v2221_v45 = vsel %vm917_vm1, %v2220_v43, 0.0  ;;  %2284 = vmatpush.msra.mxu0 %v2264_v2 }
 0xc71   : > { %v2209_v44 = vrot.slane %v2208_v58, 4  ;;  %v2222_v46 = vrot.slane %v2221_v45, 4 }
 0xc72   : > { %2285 = vmatpush.msra.mxu0 %v2263_v3 }
 0xc73   : > { %v2210_v47 = vadd.f32 %v2209_v44, %v2208_v58  ;;  %v2223_v48 = vadd.f32 %v2222_v46, %v2221_v45 }
 0xc75   : > { %v2211_v49 = vrot.slane %v2210_v47, 2  ;;  %v2224_v50 = vrot.slane %v2223_v48, 2 }
 0xc77   : > { %v2212_v51 = vadd.f32 %v2211_v49, %v2210_v47  ;;  %v2225_v52 = vadd.f32 %v2224_v50, %v2223_v48 }
 0xc79   : > { %v2213_v54 = vrot.slane %v2212_v51, 1  ;;  %v2226_v55 = vrot.slane %v2225_v52, 1 }
 0xc7b   : > { %v2214_v56 = vadd.f32 %v2213_v54, %v2212_v51  ;;  %v2227_v31 = vadd.f32 %v2226_v55, %v2225_v52 }
 0xc7d   : > { %v2229_v57 = vsel %vm2228_vm12, %v2214_v56, %v2227_v31 }
 0xc7e   : > { %v2233_v59 = vsel %vm2232_vm13, %v2229_v57, 0.0 }
 0xc7f   : > { %2234 = vadd.xlane.f32.xlu0 %v2233_v59 }
 0xcf2   : > { %v2235_v60 = vpop.xlane.xlu0 %2234 }
 0xcf3   : > { %v2236_v5 = vmul.f32 %v2235_v60, %v3017_v15 }
 0xcf5   : > { %v2237_v61 = vsub.f32 %v2229_v57, %v2236_v5 }
 0xcf7   : > { %v2238_v62 = vmul.f32 %v2237_v61, %v2237_v61 }
 0xcf9   : > { %v2239_v63 = vsel %vm2232_vm13, %v2238_v62, 0.0 }
 0xcfa   : > { %2240 = vadd.xlane.f32.xlu0 %v2239_v63 }
 0xd6d   : > { %v2241_v4 = vpop.xlane.xlu0 %2240 }
 0xd6e   : > { %v2242_v8 = vmul.f32 %v2241_v4, %v3017_v15  ;;  %v2730_v15 = vld [vmem:[%s3421_s30] ss:$0 sm:$0xff] }
 0xd70   : > { %v2243_v9 = vadd.f32 1e-05, %v2242_v8 }
 0xd72   : > { %2731 = vrsqrt.f32 %v2243_v9  ;;  %vm2250_vm15 = vweird.f32 %v2243_v9 }
 0xd78   : > { %v2732_v10 = vpop.eup %2731 }
 0xd79   : > { %v2245_v11 = vmul.f32 %v2732_v10, %v2243_v9  ;;  %vm2251_vm14 = vweird.f32 %v2732_v10 }
 0xd7a   : > { %vm2252_vm0 = vmor %vm2250_vm15, %vm2251_vm14 }
 0xd7b   : > { %v2246_v12 = vmul.f32 %v2732_v10, %v2245_v11 }
 0xd7d   : > { %v2247_v13 = vmul.f32 0.5, %v2246_v12 }
 0xd7f   : > { %v2248_v14 = vsub.f32 1.5, %v2247_v13 }
 0xd81   : > { %v2249_v16 = vmul.f32 %v2732_v10, %v2248_v14 }
 0xd83   : > { %v2253_v6 = vsel %vm2252_vm0, %v2732_v10, %v2249_v16 }
 0xd84   : > { %v2254_v19 = vmul.f32 %v2253_v6, %v2237_v61 }
 0xd86   : > { %v2258_v20 = vmul.f32 %v2729_v0, %v2254_v19 }
 0xd88   : > { %v2262_v21 = vadd.f32 %v2730_v15, %v2258_v20 }
 0xd8a   : > { %2631 = vmatmul.msk.f32.vlgmr.msra.gmra.mxu0 %vm917_vm1, %v2262_v21 }
 0xe07   : > { %v2287_v23 = vpop.f32.mrf.mxu0 }
 0xe08   : > { %2291 = vst.msk [vmem:[#allocation5] sm:$0x3] %vm2290_vm2, %v2287_v23 }
 0xe09 PF: > { %p2646_p6 = scmp.eq.s32.totalorder %s2915_s0, 1  ;;  %s2790_s1 = smov [#allocation5]  }
 0xe0a   : > { %s2298_s5 = sshll.u32 %s2790_s1, 4  ;;  %s3422_s29 = sld [smem:[#allocation28_spill]]  ;;  %s2299_s5 = int_to_ptr.vmem [resolvable:$true] %s2298_s5 }
 0xe10   : > { %s2300_s11 = sshll.u32 %s3422_s29, 4  ;;  %s2301_s11 = int_to_ptr.hbm [resolvable:$true] %s2300_s11 }
 0xe11   : > { %2643 = dma.vmem_to_hbm [thread:$0]  (%p2646_p6), %s2299_s5, 32, %s2301_s11, [#allocation6]  }
 0xe12   : > { %2780 = dma.done.wait (%p2646_p6), [#allocation6], 32  }
 0xe13   : > { %2782 = vsyncadd (%p2646_p6), [#allocation6], 4294967264 }
 0xe14 PF: > { %s3423_s12 = sld [smem:[#allocation9_spill]] }
 0xe1a   : > { %s41_s4 = sadd.s32 1, %s3423_s12  }
 0xe1b   : > { %p38_p7 = scmp.ge.s32.totalorder %s41_s4, 4  }
 0xe1d   :  { %40 = sbr.rel (!%p38_p7) target bundleno = 31 (0x1f), region = 205 }
 0xe22   :  { %2314 = vsyncpa [#allocation6], 1 }
 0xe23   :  { %2316 = vsyncpa [#allocation6 + $0x1], 1 }

</bundles_post_ra>
